<compile_context>
chip_gen: v7x
topology: tpu7x:2x2x1
jax: 0.10.0
libtpu: 0.0.40
codegen_flags: <defaults>
</compile_context>

<pallas_src>
import math
import functools

import jax
import jax.numpy as jnp
from jax.experimental import pallas as pl
from jax.experimental.pallas import tpu as pltpu


# ----------------------------------------------------------------------------
# helpers
# ----------------------------------------------------------------------------
def _round_up(x, m):
    return ((x + m - 1) // m) * m


def _pick_tm(M, cands=(512, 448, 384, 320, 256, 224, 128)):
    """Row tile for M: a large divisor when one exists, otherwise pad."""
    for tm in cands:
        if M >= tm and M % tm == 0:
            return tm, M
    if M <= 128:
        tm = max(8, _round_up(M, 8))
        return tm, tm
    return 256, _round_up(M, 256)


def _pick_tn(C):
    if C % 256 == 0:
        return 256
    if C % 128 == 0:
        return 128
    return C                      # narrow channel count (e.g. 64): full dim


# ----------------------------------------------------------------------------
# MXU matmul kernels (bf16 in, f32 accumulate)
# ----------------------------------------------------------------------------
def _mm_stats_kernel(a_ref, b_ref, o_ref, sum_ref, sq_ref):
    """(tm,K)@(K,tn); also emits per-channel partial sum / sum-of-squares."""
    acc = jnp.dot(a_ref[...], b_ref[...], preferred_element_type=jnp.float32)
    o_ref[...] = acc.astype(o_ref.dtype)
    sum_ref[0] = jnp.sum(acc, axis=0, keepdims=True)
    sq_ref[0] = jnp.sum(acc * acc, axis=0, keepdims=True)


def _mm_bias_kernel(a_ref, b_ref, bias_ref, o_ref):
    acc = jnp.dot(a_ref[...], b_ref[...], preferred_element_type=jnp.float32)
    o_ref[...] = (acc + bias_ref[...]).astype(o_ref.dtype)


def pallas_conv_matmul(a, b):
    """(M,K)@(K,C) in bf16 on the MXU. No bias (convs are bias-free).

    Returns (out (M,C) bf16, per-channel sum (C,), per-channel sum-of-squares
    (C,)) computed from the f32 accumulator.  K is never tiled (max K in this
    network is 2304, a single VMEM-resident block); rows are padded only if no
    large divisor of M exists.
    """
    M, K = a.shape
    C = b.shape[1]
    a16 = a.astype(jnp.bfloat16)
    b16 = b.astype(jnp.bfloat16)
    tn = _pick_tn(C)
    tm, Mp = _pick_tm(M)
    if Mp != M:
        a16 = jnp.pad(a16, ((0, Mp - M), (0, 0)))
    gm, gn = Mp // tm, C // tn

    out, sums, sqs = pl.pallas_call(
        _mm_stats_kernel,
        out_shape=(jax.ShapeDtypeStruct((Mp, C), jnp.bfloat16),
                   jax.ShapeDtypeStruct((gm, 1, C), jnp.float32),
                   jax.ShapeDtypeStruct((gm, 1, C), jnp.float32)),
        grid=(gm, gn),
        in_specs=[pl.BlockSpec((tm, K), lambda i, j: (i, 0)),
                  pl.BlockSpec((K, tn), lambda i, j: (0, j))],
        out_specs=(pl.BlockSpec((tm, tn), lambda i, j: (i, j)),
                   pl.BlockSpec((1, 1, tn), lambda i, j: (i, 0, j)),
                   pl.BlockSpec((1, 1, tn), lambda i, j: (i, 0, j))),
        compiler_params=pltpu.CompilerParams(
            dimension_semantics=("parallel", "parallel")),
    )(a16, b16)
    if Mp != M:
        out = out[:M]
    return out, jnp.sum(sums, axis=(0, 1)), jnp.sum(sqs, axis=(0, 1))


def pallas_fc(a, w, bias):
    """Final linear layer: (M,K)@(K,C)+bias, f32 output."""
    M, K = a.shape
    C = w.shape[1]
    Cp = _round_up(C, 128)
    tn = _pick_tn(Cp)
    a16 = a.astype(jnp.bfloat16)
    w16 = jnp.pad(w, ((0, 0), (0, Cp - C))).astype(jnp.bfloat16)
    bias_p = jnp.pad(bias, (0, Cp - C)).astype(jnp.float32).reshape(1, Cp)
    tm, Mp = _pick_tm(M)
    if Mp != M:
        a16 = jnp.pad(a16, ((0, Mp - M), (0, 0)))

    out = pl.pallas_call(
        _mm_bias_kernel,
        out_shape=jax.ShapeDtypeStruct((Mp, Cp), jnp.float32),
        grid=(Mp // tm, Cp // tn),
        in_specs=[pl.BlockSpec((tm, K), lambda i, j: (i, 0)),
                  pl.BlockSpec((K, tn), lambda i, j: (0, j)),
                  pl.BlockSpec((1, tn), lambda i, j: (0, j))],
        out_specs=pl.BlockSpec((tm, tn), lambda i, j: (i, j)),
        compiler_params=pltpu.CompilerParams(
            dimension_semantics=("parallel", "parallel")),
    )(a16, w16, bias_p)
    return out[:M, :C]


# ----------------------------------------------------------------------------
# Direct (im2col-free) stride-1 3x3 convolution
# ----------------------------------------------------------------------------
def _conv3x3_kernel(x_ref, w_ref, o_ref, sum_ref, sq_ref, *, Hp, Wp8, OH, OW):
    # x_ref: (1, Hp*Wp8, Cin) bf16 -- the whole zero-padded image, flattened so
    #        the row merge/split below is layout-trivial (Wp8 % 8 == 0).
    # w_ref: (9, Cin, tn) bf16
    x2 = x_ref[0]
    tn = w_ref.shape[2]
    acc = jnp.zeros((OH, OW, tn), jnp.float32)
    for t in range(9):
        di, dj = t // 3, t % 3
        y = jnp.dot(x2, w_ref[t], preferred_element_type=jnp.float32)
        y3 = y.reshape(Hp, Wp8, tn)               # layout-trivial split
        acc = acc + y3[di:di + OH, dj:dj + OW, :]
    o_ref[0] = acc.astype(o_ref.dtype)
    # per-channel partial BN statistics (reduce spatial dims, keep rank >= 2)
    s2 = jnp.sum(acc, axis=1)
    sum_ref[0] = jnp.sum(s2, axis=0, keepdims=True)
    q2 = jnp.sum(acc * acc, axis=1)
    sq_ref[0] = jnp.sum(q2, axis=0, keepdims=True)


def _conv3x3_s1_direct(x, w):
    N, H, W, Cin = x.shape
    Cout = w.shape[-1]
    OH, OW = H, W
    Hp = H + 2
    Wp8 = _round_up(W + 2, 8)
    xp = jnp.pad(x.astype(jnp.bfloat16),
                 ((0, 0), (1, 1), (1, Wp8 - W - 1), (0, 0)))
    xf = xp.reshape(N, Hp * Wp8, Cin)
    wf = w.astype(jnp.bfloat16).reshape(9, Cin, Cout)
    tn = _pick_tn(Cout)
    gj = Cout // tn
    kern = functools.partial(_conv3x3_kernel, Hp=Hp, Wp8=Wp8, OH=OH, OW=OW)

    out, sums, sqs = pl.pallas_call(
        kern,
        out_shape=(jax.ShapeDtypeStruct((N, OH, OW, Cout), jnp.bfloat16),
                   jax.ShapeDtypeStruct((N, 1, Cout), jnp.float32),
                   jax.ShapeDtypeStruct((N, 1, Cout), jnp.float32)),
        grid=(N, gj),
        in_specs=[pl.BlockSpec((1, Hp * Wp8, Cin), lambda n, j: (n, 0, 0)),
                  pl.BlockSpec((9, Cin, tn), lambda n, j: (0, 0, j))],
        out_specs=(pl.BlockSpec((1, OH, OW, tn), lambda n, j: (n, 0, 0, j)),
                   pl.BlockSpec((1, 1, tn), lambda n, j: (n, 0, j)),
                   pl.BlockSpec((1, 1, tn), lambda n, j: (n, 0, j))),
        compiler_params=pltpu.CompilerParams(
            dimension_semantics=("parallel", "parallel")),
    )(xf, wf)
    return out, jnp.sum(sums, axis=(0, 1)), jnp.sum(sqs, axis=(0, 1))


_DIRECT_CONV_OK = True


def conv3x3_s1(x, w):
    """Stride-1 3x3 conv: direct Pallas kernel, im2col+matmul as a fallback."""
    global _DIRECT_CONV_OK
    if _DIRECT_CONV_OK:
        try:
            return _conv3x3_s1_direct(x, w)
        except Exception:                    # lowering fallback (keeps it running)
            _DIRECT_CONV_OK = False
    N = x.shape[0]
    Cout = w.shape[-1]
    a, OH, OW = _im2col(x, 3, 3, 1, 1)
    out2d, s, q = pallas_conv_matmul(a, w.reshape(-1, Cout))
    return out2d.reshape(N, OH, OW, Cout), s, q


# ----------------------------------------------------------------------------
# im2col glue (only for the 7x7 stem and the few stride-2 convolutions)
# ----------------------------------------------------------------------------
def _im2col(x, KH, KW, stride, padding):
    N, H, W, Cin = x.shape
    OH = (H + 2 * padding - KH) // stride + 1
    OW = (W + 2 * padding - KW) // stride + 1
    xp = jnp.pad(x, ((0, 0), (padding, padding), (padding, padding), (0, 0)))
    cols = [xp[:, di:di + stride * (OH - 1) + 1:stride,
               dj:dj + stride * (OW - 1) + 1:stride, :]
            for di in range(KH) for dj in range(KW)]
    patches = jnp.stack(cols, axis=3)                 # (N,OH,OW,KH*KW,Cin)
    return patches.reshape(N * OH * OW, KH * KW * Cin), OH, OW


# ----------------------------------------------------------------------------
# BatchNorm (training-mode batch statistics) -> fused affine(+residual)(+ReLU)
# ----------------------------------------------------------------------------
def bn_scale_shift(sums, sqs, count, gamma, beta, eps=1e-5):
    mean = sums / count
    var = jnp.maximum(sqs / count - mean * mean, 0.0)   # guard cancellation
    scale = gamma * jax.lax.rsqrt(var + eps)
    shift = beta - mean * scale
    return scale, shift


def _affine_kernel(x_ref, s_ref, b_ref, o_ref, *, relu):
    y = x_ref[...].astype(jnp.float32) * s_ref[...] + b_ref[...]
    if relu:
        y = jnp.maximum(y, 0.0)
    o_ref[...] = y.astype(o_ref.dtype)


def _affine_res_kernel(x_ref, s_ref, b_ref, r_ref, rs_ref, rb_ref, o_ref, *, relu):
    y = (x_ref[...].astype(jnp.float32) * s_ref[...] + b_ref[...]
         + r_ref[...].astype(jnp.float32) * rs_ref[...] + rb_ref[...])
    if relu:
        y = jnp.maximum(y, 0.0)
    o_ref[...] = y.astype(o_ref.dtype)


def fused_affine(x2d, scale, shift, relu, residual=None, rscale=None, rshift=None):
    """y = relu?(x*scale + shift [+ res*rscale + rshift]) on (M, C) bf16 data.

    C=64 tensors are re-packed to 128 lanes (scale/shift tiled) so stores stay
    lane-dense; elementwise math is done in f32 and stored as bf16.
    """
    M, C = x2d.shape
    rep = 1
    if C < 128 and 128 % C == 0 and M % (128 // C) == 0:
        rep = 128 // C
    Ml, Cl = M // rep, C * rep
    x2 = x2d.reshape(Ml, Cl)
    s2 = jnp.tile(scale.astype(jnp.float32), rep).reshape(1, Cl)
    b2 = jnp.tile(shift.astype(jnp.float32), rep).reshape(1, Cl)
    tm, Mp = _pick_tm(Ml)
    if Mp != Ml:
        x2 = jnp.pad(x2, ((0, Mp - Ml), (0, 0)))

    args = [x2, s2, b2]
    in_specs = [pl.BlockSpec((tm, Cl), lambda i: (i, 0)),
                pl.BlockSpec((1, Cl), lambda i: (0, 0)),
                pl.BlockSpec((1, Cl), lambda i: (0, 0))]
    if residual is not None:
        r2 = residual.reshape(Ml, Cl)
        if Mp != Ml:
            r2 = jnp.pad(r2, ((0, Mp - Ml), (0, 0)))
        rs2 = jnp.tile(rscale.astype(jnp.float32), rep).reshape(1, Cl)
        rb2 = jnp.tile(rshift.astype(jnp.float32), rep).reshape(1, Cl)
        args += [r2, rs2, rb2]
        in_specs += [pl.BlockSpec((tm, Cl), lambda i: (i, 0)),
                     pl.BlockSpec((1, Cl), lambda i: (0, 0)),
                     pl.BlockSpec((1, Cl), lambda i: (0, 0))]
        kernel = functools.partial(_affine_res_kernel, relu=relu)
    else:
        kernel = functools.partial(_affine_kernel, relu=relu)

    out = pl.pallas_call(
        kernel,
        out_shape=jax.ShapeDtypeStruct((Mp, Cl), jnp.bfloat16),
        grid=(Mp // tm,),
        in_specs=in_specs,
        out_specs=pl.BlockSpec((tm, Cl), lambda i: (i, 0)),
        compiler_params=pltpu.CompilerParams(dimension_semantics=("parallel",)),
    )(*args)
    if Mp != Ml:
        out = out[:Ml]
    return out.reshape(M, C)


# ----------------------------------------------------------------------------
# MaxPool 3x3 / stride 2 / pad 1  (lane-dense, 9 shifted views, no stack buffer)
# ----------------------------------------------------------------------------
def _max9_kernel(*refs):
    out_ref = refs[-1]
    m = refs[0][...].astype(jnp.float32)
    for r in refs[1:-1]:
        m = jnp.maximum(m, r[...].astype(jnp.float32))
    out_ref[...] = m.astype(out_ref.dtype)


def maxpool_3x3_s2_p1(x):
    N, H, W, C = x.shape
    OH = (H - 1) // 2 + 1
    OW = (W - 1) // 2 + 1
    neg = jnp.finfo(x.dtype).min                       # bf16-aware lowest value
    xp = jnp.pad(x, ((0, 0), (1, 1), (1, 1), (0, 0)), constant_values=neg)
    taps = [xp[:, di:di + 2 * (OH - 1) + 1:2, dj:dj + 2 * (OW - 1) + 1:2, :]
            for di in range(3) for dj in range(3)]
    total = N * OH * OW * C
    lane = 128 if total % 128 == 0 else C
    rows = total // lane
    taps = [t.reshape(rows, lane) for t in taps]
    tm, Mp = _pick_tm(rows)
    if Mp != rows:
        taps = [jnp.pad(t, ((0, Mp - rows), (0, 0)), constant_values=neg)
                for t in taps]

    out = pl.pallas_call(
        _max9_kernel,
        out_shape=jax.ShapeDtypeStruct((Mp, lane), x.dtype),
        grid=(Mp // tm,),
        in_specs=[pl.BlockSpec((tm, lane), lambda i: (i, 0)) for _ in range(9)],
        out_specs=pl.BlockSpec((tm, lane), lambda i: (i, 0)),
        compiler_params=pltpu.CompilerParams(dimension_semantics=("parallel",)),
    )(*taps)
    if Mp != rows:
        out = out[:rows]
    return out.reshape(N, OH, OW, C)


# ----------------------------------------------------------------------------
# Global 7x7 average pool
# ----------------------------------------------------------------------------
def _avgpool_kernel(x_ref, o_ref):
    o_ref[...] = jnp.mean(x_ref[...].astype(jnp.float32), axis=1)


def avgpool_global(x):
    N, H, W, C = x.shape
    xr = x.reshape(N, H * W, C)
    return pl.pallas_call(
        _avgpool_kernel,
        out_shape=jax.ShapeDtypeStruct((N, C), jnp.float32),
        grid=(1,),
        in_specs=[pl.BlockSpec((N, H * W, C), lambda i: (0, 0, 0))],
        out_specs=pl.BlockSpec((N, C), lambda i: (0, 0)),
    )(xr)


# ----------------------------------------------------------------------------
# BasicBlock (expansion = 1)
# ----------------------------------------------------------------------------
def basic_block(x, bp):
    N, H, W, Cin = x.shape
    stride = bp['stride']
    planes = bp['w1'].shape[-1]

    # conv1 (+ BN1 stats) ----------------------------------------------------
    if stride == 1:
        out1, s1, q1 = conv3x3_s1(x, bp['w1'])
        OH, OW = out1.shape[1], out1.shape[2]
        out1_2d = out1.reshape(-1, planes)
    else:
        a, OH, OW = _im2col(x, 3, 3, stride, 1)
        out1_2d, s1, q1 = pallas_conv_matmul(a, bp['w1'].reshape(-1, planes))
    M = N * OH * OW
    sc1, sh1 = bn_scale_shift(s1, q1, M, bp['g1'], bp['b1'])
    act1 = fused_affine(out1_2d, sc1, sh1, relu=True).reshape(N, OH, OW, planes)

    # conv2 (+ BN2 stats) ----------------------------------------------------
    out2, s2, q2 = conv3x3_s1(act1, bp['w2'])
    out2_2d = out2.reshape(-1, planes)
    sc2, sh2 = bn_scale_shift(s2, q2, M, bp['g2'], bp['b2'])

    # residual branch ---------------------------------------------------------
    if 'wd' in bp:
        xs = x[:, ::stride, ::stride, :].reshape(M, Cin)
        res_raw, sd, qd = pallas_conv_matmul(xs, bp['wd'].reshape(Cin, planes))
        scd, shd = bn_scale_shift(sd, qd, M, bp['gd'], bp['bd'])
    else:
        res_raw = x.reshape(M, planes)
        scd = jnp.ones((planes,), jnp.float32)
        shd = jnp.zeros((planes,), jnp.float32)

    # BN2 affine + downsample-BN affine + residual add + ReLU in one pass ----
    y2d = fused_affine(out2_2d, sc2, sh2, relu=True,
                       residual=res_raw, rscale=scd, rshift=shd)
    return y2d.reshape(N, OH, OW, planes)


# ----------------------------------------------------------------------------
# Parameter construction (deterministic, mirrors the torch __init__)
# ----------------------------------------------------------------------------
def _init_conv(key, kh, kw, cin, cout):
    n = kh * kw * cout
    return jax.random.normal(key, (kh, kw, cin, cout),
                             jnp.float32) * math.sqrt(2.0 / n)


def build_params(key, layers_cfg=(1, 1, 1, 1), num_classes=1000):
    keys = iter(jax.random.split(key, 256))
    p = {'conv1': _init_conv(next(keys), 7, 7, 3, 64),
         'bn1_g': jnp.ones(64, jnp.float32),
         'bn1_b': jnp.zeros(64, jnp.float32)}
    inplanes = 64
    all_layers = []
    for planes, nblocks, stride in zip((64, 128, 256, 512), layers_cfg,
                                       (1, 2, 2, 2)):
        blocks = []
        for bi in range(nblocks):
            s = stride if bi == 0 else 1
            bp = {'stride': s,
                  'w1': _init_conv(next(keys), 3, 3, inplanes, planes),
                  'g1': jnp.ones(planes, jnp.float32),
                  'b1': jnp.zeros(planes, jnp.float32),
                  'w2': _init_conv(next(keys), 3, 3, planes, planes),
                  'g2': jnp.ones(planes, jnp.float32),
                  'b2': jnp.zeros(planes, jnp.float32)}
            if s != 1 or inplanes != planes:
                bp['wd'] = _init_conv(next(keys), 1, 1, inplanes, planes)
                bp['gd'] = jnp.ones(planes, jnp.float32)
                bp['bd'] = jnp.zeros(planes, jnp.float32)
            inplanes = planes
            blocks.append(bp)
        all_layers.append(blocks)
    p['layers'] = all_layers
    bound = 1.0 / math.sqrt(512)   # torch.nn.Linear default init
    p['fc_w'] = jax.random.uniform(next(keys), (512, num_classes),
                                   jnp.float32, -bound, bound)
    p['fc_b'] = jax.random.uniform(next(keys), (num_classes,),
                                   jnp.float32, -bound, bound)
    return p


# ----------------------------------------------------------------------------
# Full forward pass
# ----------------------------------------------------------------------------
def ccn_resnet_forward(params, x_nchw):
    x = jnp.transpose(x_nchw, (0, 2, 3, 1)).astype(jnp.bfloat16)   # NCHW->NHWC

    # stem: 7x7/s2 conv (K=147, single full-K block) + BN + ReLU + maxpool
    N = x.shape[0]
    a, OH, OW = _im2col(x, 7, 7, 2, 3)
    M = N * OH * OW
    out2d, s, q = pallas_conv_matmul(a, params['conv1'].reshape(-1, 64))
    sc, sh = bn_scale_shift(s, q, M, params['bn1_g'], params['bn1_b'])
    act = fused_affine(out2d, sc, sh, relu=True).reshape(N, OH, OW, 64)
    x = maxpool_3x3_s2_p1(act)                               # (N,56,56,64)

    for layer in params['layers']:
        for bp in layer:
            x = basic_block(x, bp)

    pooled = avgpool_global(x)                               # (N,512) f32
    return pallas_fc(pooled, params['fc_w'], params['fc_b'])


# ----------------------------------------------------------------------------
if __name__ == "__main__":
    key = jax.random.PRNGKey(0)
    pkey, xkey = jax.random.split(key)

    # layers=(1,1,1,1) keeps the network small; the spatial sizes hard-coded
    # in the module (56/28/14/7 and AvgPool2d(7)) require a 224x224 input.
    params = build_params(pkey, layers_cfg=(1, 1, 1, 1), num_classes=1000)

    x = jax.random.normal(xkey, (2, 3, 224, 224), jnp.float32)   # NCHW input
    out = ccn_resnet_forward(params, x)
    out = jax.block_until_ready(out)

    assert out.shape == (2, 1000) and out.dtype == jnp.float32
    assert bool(jnp.all(jnp.isfinite(out)))
    print("KERNEL_OK")
</pallas_src>

<mosaic_0001>
module attributes {stable_mosaic.version = 11 : i64} {
  func.func @_mm_stats_kernel(%arg0: i32, %arg1: i32, %arg2: memref<512x147xbf16, #tpu.memory_space<vmem>>, %arg3: memref<147x64xbf16, #tpu.memory_space<vmem>>, %arg4: memref<512x64xbf16, #tpu.memory_space<vmem>>, %arg5: memref<1x1x64xf32, #tpu.memory_space<vmem>>, %arg6: memref<1x1x64xf32, #tpu.memory_space<vmem>>) attributes {dimension_semantics = [#tpu.dimension_semantics<parallel>, #tpu.dimension_semantics<parallel>], iteration_bounds = array<i64: 49, 1>, scalar_prefetch = 0 : i64, scratch_operands = 0 : i64, tpu.core_type = #tpu.core_type<tc>, window_params = [{transform_indices = @transform_0, window_bounds = array<i64: 512, 147>}, {transform_indices = @transform_1, window_bounds = array<i64: 147, 64>}, {transform_indices = @transform_2, window_bounds = array<i64: 512, 64>}, {transform_indices = @transform_3, window_bounds = array<i64: 1, 1, 64>}, {transform_indices = @transform_4, window_bounds = array<i64: 1, 1, 64>}]} {
    %c0 = arith.constant 0 : index
    %c0_0 = arith.constant 0 : index
    %0 = vector.load %arg2[%c0, %c0_0] : memref<512x147xbf16, #tpu.memory_space<vmem>>, vector<512x147xbf16>
    %c0_1 = arith.constant 0 : index
    %c0_2 = arith.constant 0 : index
    %1 = vector.load %arg3[%c0_1, %c0_2] : memref<147x64xbf16, #tpu.memory_space<vmem>>, vector<147x64xbf16>
    %cst = arith.constant dense<0.000000e+00> : vector<512x64xf32>
    %2 = tpu.matmul %0, %1, %cst {dimension_numbers = #tpu.dot_dimension_numbers<[1], [0], [0], [1], [0, 0, 1, 1], [], []>} : vector<512x147xbf16>, vector<147x64xbf16>, vector<512x64xf32> -> vector<512x64xf32>
    %3 = arith.truncf %2 : vector<512x64xf32> to vector<512x64xbf16>
    %c0_3 = arith.constant 0 : index
    %c0_4 = arith.constant 0 : index
    %4 = vector.load %arg4[%c0_3, %c0_4] : memref<512x64xbf16, #tpu.memory_space<vmem>>, vector<512x64xbf16>
    tpu.vector_store %arg4[%c0_3, %c0_4], %3 {strides = array<i32>} : memref<512x64xbf16, #tpu.memory_space<vmem>>, vector<512x64xbf16>,
    %cst_5 = arith.constant dense<0.000000e+00> : vector<64xf32>
    %5 = vector.multi_reduction <add>, %2, %cst_5 [0] : vector<512x64xf32> to vector<64xf32>
    %6 = vector.shape_cast %5 : vector<64xf32> to vector<1x64xf32>
    %c0_6 = arith.constant 0 : index
    %c0_7 = arith.constant 0 : index
    %c0_8 = arith.constant 0 : index
    %7 = vector.load %arg5[%c0_6, %c0_7, %c0_8] : memref<1x1x64xf32, #tpu.memory_space<vmem>>, vector<1x1x64xf32>
    %8 = vector.shape_cast %7 : vector<1x1x64xf32> to vector<1x64xf32>
    %9 = vector.shape_cast %6 : vector<1x64xf32> to vector<1x1x64xf32>
    tpu.vector_store %arg5[%c0_6, %c0_7, %c0_8], %9 {strides = array<i32>} : memref<1x1x64xf32, #tpu.memory_space<vmem>>, vector<1x1x64xf32>,
    %10 = arith.mulf %2, %2 : vector<512x64xf32>
    %cst_9 = arith.constant dense<0.000000e+00> : vector<64xf32>
    %11 = vector.multi_reduction <add>, %10, %cst_9 [0] : vector<512x64xf32> to vector<64xf32>
    %12 = vector.shape_cast %11 : vector<64xf32> to vector<1x64xf32>
    %c0_10 = arith.constant 0 : index
    %c0_11 = arith.constant 0 : index
    %c0_12 = arith.constant 0 : index
    %13 = vector.load %arg6[%c0_10, %c0_11, %c0_12] : memref<1x1x64xf32, #tpu.memory_space<vmem>>, vector<1x1x64xf32>
    %14 = vector.shape_cast %13 : vector<1x1x64xf32> to vector<1x64xf32>
    %15 = vector.shape_cast %12 : vector<1x64xf32> to vector<1x1x64xf32>
    tpu.vector_store %arg6[%c0_10, %c0_11, %c0_12], %15 {strides = array<i32>} : memref<1x1x64xf32, #tpu.memory_space<vmem>>, vector<1x1x64xf32>,
    return
  }
  func.func @transform_0(%arg0: i32, %arg1: i32) -> (i32, i32) {
    %c0_i32 = arith.constant 0 : i32
    %c0_i32_0 = arith.constant 0 : i32
    return %arg0, %c0_i32 : i32, i32
  }
  func.func @transform_1(%arg0: i32, %arg1: i32) -> (i32, i32) {
    %c0_i32 = arith.constant 0 : i32
    %c0_i32_0 = arith.constant 0 : i32
    return %c0_i32, %arg1 : i32, i32
  }
  func.func @transform_2(%arg0: i32, %arg1: i32) -> (i32, i32) {
    %c0_i32 = arith.constant 0 : i32
    return %arg0, %arg1 : i32, i32
  }
  func.func @transform_3(%arg0: i32, %arg1: i32) -> (i32, i32, i32) {
    %c0_i32 = arith.constant 0 : i32
    %c0_i32_0 = arith.constant 0 : i32
    return %arg0, %c0_i32, %arg1 : i32, i32, i32
  }
  func.func @transform_4(%arg0: i32, %arg1: i32) -> (i32, i32, i32) {
    %c0_i32 = arith.constant 0 : i32
    %c0_i32_0 = arith.constant 0 : i32
    return %arg0, %c0_i32, %arg1 : i32, i32, i32
  }
}

</mosaic_0001>

<bundles_post_ra>
// kernel: tpu_custom_call.1
= control target key start
LH: loop header
LB: loop body
LE: loop exit
PB: predicated region body
PF: predicated region fallthrough
CT: control target
= control target key end

     0   :  { %10 = vsyncpa [#allocation3], 0  ;;  %s3272_s0 = inlined_call_operand.vmem [shape: bf16[25088,147], index: 0, kind: input, shape index: {}]   ;;  %s3273_s1 = inlined_call_operand.vmem [shape: bf16[147,64], index: 1, kind: input, shape index: {}]   ;;  %s3274_s2 = inlined_call_operand.vmem [shape: bf16[25088,64], index: 2, kind: output, shape index: {0}]   ;;  %s3275_s3 = inlined_call_operand.hbm [shape: f32[49,1,64], index: 3, kind: output, shape index: {1}]   ;;  %s3276_s4 = inlined_call_operand.hbm [shape: f32[49,1,64], index: 4, kind: output, shape index: {2}]  }
   0x1   :  { %12 = vsyncpa [#allocation3 + $0x1], 0 }
   0x2   :  { %13 = vsyncpa [#allocation5], 0 }
   0x3   :  { %15 = vsyncpa [#allocation5 + $0x1], 0  ;;  %s2504_s15 = smov 0   ;;  %s2506_s16 = smov 0  }
   0x4   :  { %s2508_s17 = smov 0   ;;  %s2510_s18 = smov 0  }
   0x5   :  { %s2512_s19 = smov 0   ;;  %s2514_s20 = smov 0  }
   0x6 LB: > { %s1925_s21 = sadd.s32 4294967295, %s2473_s20   ;;  %s1926_s22 = sadd.s32 4294967294, %s2473_s20   ;;  %s2473_s20 = sphi %s2514_s20, %s21_s20   ;;  %s2469_s19 = sphi %s2512_s19, %s3283_s19   ;;  %s2465_s18 = sphi %s2510_s18, %s3282_s18   ;;  %s2461_s17 = sphi %s2508_s17, %s3281_s17   ;;  %s2457_s16 = sphi %s2506_s16, %s3280_s16   ;;  %s2453_s15 = sphi %s2504_s15, %s3279_s15  }
   0x7   : > { %s33_s23 = sadd.s32 1, %s2469_s19  ;;  %s122_s24 = sadd.s32 1, %s2461_s17 }
   0x8   : > { %p35_p0 = scmp.ge.s32.totalorder %s33_s23, 49  ;;  %p132_p1 = scmp.ne.s32.totalorder %s2461_s17, %s2457_s16 }
   0x9   : > { %p133_p2 = scmp.eq.s32.totalorder %s1925_s21, 48  ;;  %p138_p3 = scmp.ne.s32.totalorder %s2457_s16, %s2453_s15 }
   0xa   : > { %s3285_s23 = smov (%p35_p0, %s33_s23), 0  ;;  %p139_p5 = scmp.eq.s32.totalorder %s1926_s22, 48 }
   0xb   : > { %p2544_p4 = por %p133_p2, %p132_p1  ;;  %s117_s26 = ssub.s32 %s2469_s19, %s3285_s23 }
   0xc   : > { %p1930_p6 = scmp.ge.s32.totalorder %s2473_s20, 1  ;;  %p120_p7 = scmp.eq.s32.totalorder %s117_s26, 0 }
   0xd   : > { %p2551_p8 = por %p139_p5, %p138_p3  ;;  %p202_p9 = scmp.lt.s32.totalorder %s2473_s20, 50 }
   0xe   : > { %s2557_s28 = scalar_select %p120_p7, %s2461_s17, %s122_s24  }
   0xf   : > { %p203_p10 = pnand %p1930_p6, %p202_p9 }
  0x10   : > { %v2257_v0 = vld [vmem:[%s3273_s1] sm:$0xff] (!%p203_p10)   ;;  %v2475_v1 = vmov (!%p203_p10), 0   ;;  %v2258_v2 = vld [vmem:[%s3273_s1 + $0x8] sm:$0xff] (!%p203_p10)   ;;  %v2259_v3 = vld [vmem:[%s3273_s1 + $0x10] sm:$0xff] (!%p203_p10)   ;;  %s1931_s9 = sshll.u32 (!%p203_p10), %s2465_s18, 6  ;;  %vm693_vm0 = vcmask (!%p203_p10), 154624  }
  0x11   : > { %206 = sbr.rel (%p203_p10) target bundleno = 507 (0x1fb), region = 28  ;;  %797 = vmatprep.subr.bf16.mxu0 (!%p203_p10), %v2475_v1  ;;  %2175 = vmatprep.subr.bf16.mxu1 (!%p203_p10), %v2475_v1  ;;  %p245_p11 = scmp.lt.s32.totalorder (!%p203_p10), %s1931_s9, 3135  ;;  %v2260_v4 = vld [vmem:[%s3273_s1 + $0x18] sm:$0xff] (!%p203_p10)   ;;  %v2261_v5 = vld [vmem:[%s3273_s1 + $0x20] sm:$0xff] (!%p203_p10)   ;;  %v2262_v7 = vld [vmem:[%s3273_s1 + $0x28] sm:$0xff] (!%p203_p10)   ;;  %vm790_vm1 = vcmask (!%p203_p10), 1040384  }
  0x12   : > { %798 = vmatpush1.bf16.msra.mxu0 (!%p203_p10), %v2257_v0  ;;  %2185 = vmatpush1.bf16.msra.mxu1 (!%p203_p10), %v2257_v0  ;;  %v2263_v8 = vld [vmem:[%s3273_s1 + $0x30] sm:$0xff] (!%p203_p10)   ;;  %v2264_v10 = vld [vmem:[%s3273_s1 + $0x38] sm:$0xff] (!%p203_p10)   ;;  %vm791_vm2 = vcmask (!%p203_p10), 1041408   ;;  %v2476_v11 = vmov (!%p203_p10), 65535   ;;  %v2265_v13 = vld [vmem:[%s3273_s1 + $0x40] sm:$0xff] (!%p203_p10)   ;;  %vm1342_vm3 = vcmask (!%p203_p10), 519168  }
  0x13   : > { %799 = vmatprep.subr.bf16.mxu0 (!%p203_p10), %v2475_v1  ;;  %2176 = vmatprep.subr.bf16.mxu1 (!%p203_p10), %v2475_v1  ;;  %v792_v12 = vsel (!%p203_p10), %vm790_vm1, 4294967295, %v2476_v11  ;;  %v2266_v14 = vld [vmem:[%s3273_s1 + $0x48] ss:$0 sps:$4 sm:$0x33] (!%p203_p10)   ;;  %vm1407_vm4 = vcmask (!%p203_p10), 523264   ;;  %vm1541_vm5 = vcmask (!%p203_p10), 516096  }
  0x14   : > { %v793_v15 = vsel (!%p203_p10), %vm791_vm2, %v792_v12, 0  ;;  %s2477_s14 = smov (!%p203_p10), [#allocation2]  }
  0x15   : > { %v795_v16 = vand.u32 (!%p203_p10), %v2266_v14, %v793_v15  ;;  %s2367_s22 = sshll.u32 (!%p203_p10), %s2477_s14, 4  ;;  %s2368_s22 = int_to_ptr.vmem [resolvable:$false] %s2367_s22 }
  0x16   : > { %800 = vmatpush1.bf16.msra.mxu0 (!%p203_p10), %v2258_v2  ;;  %2186 = vmatpush1.bf16.msra.mxu1 (!%p203_p10), %v2258_v2 }
  0x17   : > { %801 = vmatprep.subr.bf16.mxu0 (!%p203_p10), %v2475_v1  ;;  %2177 = vmatprep.subr.bf16.mxu1 (!%p203_p10), %v2475_v1 }
  0x18   : > { %s3287_s9 = smov (!%p245_p11, %s1931_s9), 3135 }
  0x19   : > { %s2110_s12 = sshll.u32 %s3287_s9, 3  ;;  %s1935_s13 = sshll.u32 %s3287_s9, 2 }
  0x1a   : > { %802 = vmatpush1.bf16.msra.mxu0 %v2259_v3  ;;  %2187 = vmatpush1.bf16.msra.mxu1 %v2259_v3  ;;  %s2578_s21 = scalar_lea.vmem %s3272_s0, %s2110_s12  ;;  %s2698_s24 = scalar_lea.vmem %s3274_s2, %s1935_s13 }
  0x1b   : > { %803 = vmatprep.subr.bf16.mxu0 %v2475_v1  ;;  %2178 = vmatprep.subr.bf16.mxu1 %v2475_v1  ;;  %v2269_v6 = vld [vmem:[%s2578_s21 + $0x4] ss:$8 sps:$4 sm:$0xff]   ;;  %v2267_v17 = vld [vmem:[%s2578_s21] ss:$8 sps:$4 sm:$0xff]   ;;  %v2270_v18 = vld [vmem:[%s2578_s21 + $0x14] ss:$8 sps:$4 sm:$0xff]  }
  0x1c   : > { %2010 = vmatprep.mubr.msk.bf16.mxu0 %vm693_vm0, %v2269_v6  ;;  %v2293_v9 = vld [vmem:[%s2578_s21 + $0x104] ss:$8 sps:$4 sm:$0xff]   ;;  %v2291_v19 = vld [vmem:[%s2578_s21 + $0x100] ss:$8 sps:$4 sm:$0xff]   ;;  %v2297_v20 = vld [vmem:[%s2578_s21 + $0x114] ss:$8 sps:$4 sm:$0xff]  }
  0x1d   : > { %2026 = vmatprep.mubr.msk.bf16.mxu1 %vm693_vm0, %v2293_v9  ;;  %v2272_v21 = vld [vmem:[%s2578_s21 + $0x10] ss:$8 sps:$4 sm:$0xff]   ;;  %v2273_v22 = vld [vmem:[%s2578_s21 + $0x24] ss:$8 sps:$4 sm:$0xff]   ;;  %v2275_v25 = vld [vmem:[%s2578_s21 + $0x20] ss:$8 sps:$4 sm:$0xff]  }
  0x1e   : > { %804 = vmatpush1.bf16.msra.mxu0 %v2260_v4  ;;  %2188 = vmatpush1.bf16.msra.mxu1 %v2260_v4  ;;  %v2299_v23 = vld [vmem:[%s2578_s21 + $0x110] ss:$8 sps:$4 sm:$0xff]   ;;  %v2303_v24 = vld [vmem:[%s2578_s21 + $0x124] ss:$8 sps:$4 sm:$0xff]   ;;  %v2276_v26 = vld [vmem:[%s2578_s21 + $0x34] ss:$8 sps:$4 sm:$0xff]  }
  0x1f   : > { %805 = vmatprep.subr.bf16.mxu0 %v2475_v1  ;;  %2179 = vmatprep.subr.bf16.mxu1 %v2475_v1  ;;  %v2305_v27 = vld [vmem:[%s2578_s21 + $0x120] ss:$8 sps:$4 sm:$0xff]   ;;  %v2309_v28 = vld [vmem:[%s2578_s21 + $0x134] ss:$8 sps:$4 sm:$0xff]   ;;  %v2278_v29 = vld [vmem:[%s2578_s21 + $0x30] ss:$8 sps:$4 sm:$0xff]  }
  0x20   : > { %v2311_v30 = vld [vmem:[%s2578_s21 + $0x130] ss:$8 sps:$4 sm:$0xff]   ;;  %v2279_v31 = vld [vmem:[%s2578_s21 + $0x44] ss:$8 sps:$4 sm:$0xff]   ;;  %v2281_v33 = vld [vmem:[%s2578_s21 + $0x40] ss:$8 sps:$4 sm:$0xff]  }
  0x21   : > { %v2315_v32 = vld [vmem:[%s2578_s21 + $0x144] ss:$8 sps:$4 sm:$0xff]   ;;  %v2317_v34 = vld [vmem:[%s2578_s21 + $0x140] ss:$8 sps:$4 sm:$0xff]   ;;  %v2282_v35 = vld [vmem:[%s2578_s21 + $0x54] ss:$8 sps:$4 sm:$0xff]  }
  0x22   : > { %806 = vmatpush1.bf16.msra.mxu0 %v2261_v5  ;;  %2189 = vmatpush1.bf16.msra.mxu1 %v2261_v5  ;;  %v2321_v36 = vld [vmem:[%s2578_s21 + $0x154] ss:$8 sps:$4 sm:$0xff]   ;;  %v2284_v37 = vld [vmem:[%s2578_s21 + $0x50] ss:$8 sps:$4 sm:$0xff]   ;;  %v2285_v39 = vld [vmem:[%s2578_s21 + $0x64] ss:$8 sps:$4 sm:$0xff]  }
  0x23   : > { %807 = vmatprep.subr.bf16.mxu0 %v2475_v1  ;;  %2180 = vmatprep.subr.bf16.mxu1 %v2475_v1  ;;  %v2323_v38 = vld [vmem:[%s2578_s21 + $0x150] ss:$8 sps:$4 sm:$0xff]   ;;  %v2327_v40 = vld [vmem:[%s2578_s21 + $0x164] ss:$8 sps:$4 sm:$0xff]   ;;  %v2287_v41 = vld [vmem:[%s2578_s21 + $0x60] ss:$8 sps:$4 sm:$0xff]  }
  0x24   : > { %v2329_v42 = vld [vmem:[%s2578_s21 + $0x160] ss:$8 sps:$4 sm:$0xff]   ;;  %v2288_v43 = vld [vmem:[%s2578_s21 + $0x74] ss:$8 sps:$4 sm:$0xff]   ;;  %v2290_v45 = vld [vmem:[%s2578_s21 + $0x70] ss:$8 sps:$4 sm:$0xff]  }
  0x25   : > { %v2333_v44 = vld [vmem:[%s2578_s21 + $0x174] ss:$8 sps:$4 sm:$0xff]   ;;  %v2335_v46 = vld [vmem:[%s2578_s21 + $0x170] ss:$8 sps:$4 sm:$0xff]   ;;  %v2294_v47 = vld [vmem:[%s2578_s21 + $0x84] ss:$8 sps:$4 sm:$0xff]  }
  0x26   : > { %808 = vmatpush1.bf16.msra.mxu0 %v2262_v7  ;;  %2190 = vmatpush1.bf16.msra.mxu1 %v2262_v7  ;;  %v2339_v48 = vld [vmem:[%s2578_s21 + $0x184] ss:$8 sps:$4 sm:$0xff]   ;;  %v2296_v49 = vld [vmem:[%s2578_s21 + $0x80] ss:$8 sps:$4 sm:$0xff]   ;;  %v2300_v51 = vld [vmem:[%s2578_s21 + $0x94] ss:$8 sps:$4 sm:$0xff]  }
  0x27   : > { %809 = vmatprep.subr.bf16.mxu0 %v2475_v1  ;;  %2181 = vmatprep.subr.bf16.mxu1 %v2475_v1  ;;  %v2341_v50 = vld [vmem:[%s2578_s21 + $0x180] ss:$8 sps:$4 sm:$0xff]   ;;  %v2342_v52 = vld [vmem:[%s2578_s21 + $0x194] ss:$8 sps:$4 sm:$0xff]   ;;  %v2302_v53 = vld [vmem:[%s2578_s21 + $0x90] ss:$8 sps:$4 sm:$0xff]  }
  0x28   : > { %v2344_v54 = vld [vmem:[%s2578_s21 + $0x190] ss:$8 sps:$4 sm:$0xff]   ;;  %v2306_v55 = vld [vmem:[%s2578_s21 + $0xa4] ss:$8 sps:$4 sm:$0xff]   ;;  %v2308_v57 = vld [vmem:[%s2578_s21 + $0xa0] ss:$8 sps:$4 sm:$0xff]  }
  0x29   : > { %v2345_v56 = vld [vmem:[%s2578_s21 + $0x1a4] ss:$8 sps:$4 sm:$0xff]   ;;  %v2347_v58 = vld [vmem:[%s2578_s21 + $0x1a0] ss:$8 sps:$4 sm:$0xff]   ;;  %v2312_v59 = vld [vmem:[%s2578_s21 + $0xb4] ss:$8 sps:$4 sm:$0xff]  }
  0x2a   : > { %810 = vmatpush1.bf16.msra.mxu0 %v2263_v8  ;;  %2191 = vmatpush1.bf16.msra.mxu1 %v2263_v8  ;;  %v2348_v60 = vld [vmem:[%s2578_s21 + $0x1b4] ss:$8 sps:$4 sm:$0xff]   ;;  %v2314_v61 = vld [vmem:[%s2578_s21 + $0xb0] ss:$8 sps:$4 sm:$0xff]   ;;  %v2318_v63 = vld [vmem:[%s2578_s21 + $0xc4] ss:$8 sps:$4 sm:$0xff]  }
  0x2b   : > { %811 = vmatprep.subr.bf16.mxu0 %v2475_v1  ;;  %2182 = vmatprep.subr.bf16.mxu1 %v2475_v1  ;;  %v2350_v62 = vld [vmem:[%s2578_s21 + $0x1b0] ss:$8 sps:$4 sm:$0xff]   ;;  %v2351_v0 = vld [vmem:[%s2578_s21 + $0x1c4] ss:$8 sps:$4 sm:$0xff]   ;;  %v2353_v2 = vld [vmem:[%s2578_s21 + $0x1c0] ss:$8 sps:$4 sm:$0xff]  }
  0x2c   : > { %v2324_v3 = vld [vmem:[%s2578_s21 + $0xd4] ss:$8 sps:$4 sm:$0xff]   ;;  %v2326_v5 = vld [vmem:[%s2578_s21 + $0xd0] ss:$8 sps:$4 sm:$0xff]   ;;  %v2330_v7 = vld [vmem:[%s2578_s21 + $0xe4] ss:$8 sps:$4 sm:$0xff]  }
  0x2d   : > { %v2354_v4 = vld [vmem:[%s2578_s21 + $0x1d4] ss:$8 sps:$4 sm:$0xff]   ;;  %v2356_v6 = vld [vmem:[%s2578_s21 + $0x1d0] ss:$8 sps:$4 sm:$0xff]   ;;  %v2357_v8 = vld [vmem:[%s2578_s21 + $0x1e4] ss:$8 sps:$4 sm:$0xff]  }
  0x2e   : > { %812 = vmatpush1.bf16.msra.mxu0 %v2264_v10  ;;  %2192 = vmatpush1.bf16.msra.mxu1 %v2264_v10  ;;  %v2332_v9 = vld [vmem:[%s2578_s21 + $0xe0] ss:$8 sps:$4 sm:$0xff]   ;;  %v2336_v11 = vld [vmem:[%s2578_s21 + $0xf4] ss:$8 sps:$4 sm:$0xff]   ;;  %v2362_v14 = vld [vmem:[%s2578_s21 + $0x1f0] ss:$8 sps:$4 sm:$0xff]  }
  0x2f   : > { %813 = vmatprep.subr.bf16.mxu0 %v2475_v1  ;;  %2183 = vmatprep.subr.bf16.mxu1 %v2475_v1  ;;  %v2359_v10 = vld [vmem:[%s2578_s21 + $0x1e0] ss:$8 sps:$4 sm:$0xff]   ;;  %v2360_v12 = vld [vmem:[%s2578_s21 + $0x1f4] ss:$8 sps:$4 sm:$0xff]   ;;  %s3181_s9 = sand.u32 1, %s2457_s16  }
  0x30   : > { %s237_s26 = scalar_lea.vmem [#allocation2], %s3181_s9  ;;  %s243_s30 = scalar_lea.vmem [#allocation4], %s3181_s9 }
  0x31   : > { %s1771_s29 = sshll.u32 %s237_s26, 4  ;;  %s1785_s5 = sshll.u32 %s243_s30, 4  ;;  %s3193_s29 = int_to_ptr.vmem [resolvable:$true] %s1771_s29  ;;  %s3201_s5 = int_to_ptr.vmem [resolvable:$true] %s1785_s5 }
  0x32   : > { %814 = vmatpush1.bf16.msra.mxu0 %v2265_v13  ;;  %2193 = vmatpush1.bf16.msra.mxu1 %v2265_v13  ;;  %v2338_v13 = vld [vmem:[%s2578_s21 + $0xf0] ss:$8 sps:$4 sm:$0xff]   ;;  %s1750_s12 = scalar_lea.sflag [#allocation3], %s3181_s9  ;;  %s2363_s13 = scalar_lea.vmem %s3193_s29, 16 }
  0x33   : > { %815 = vmatprep.subr.bf16.mxu0 %v2475_v1  ;;  %2184 = vmatprep.subr.bf16.mxu1 %v2475_v1  ;;  %v2320_v1 = vld [vmem:[%s2578_s21 + $0xc0] ss:$8 sps:$4 sm:$0xff]   ;;  %s2106_s21 = sshll.u32 %s2465_s18, 4  ;;  %p2364_p12 = scmp.ne.s32.totalorder %s3193_s29, %s2363_s13 }
  0x34   : > { %s3191_s8 = scalar_lea.hbm %s3275_s3, %s2106_s21  ;;  %s3199_s11 = scalar_lea.hbm %s3276_s4, %s2106_s21 }
  0x35   : > { %p2365_p13 = pnand %p2364_p12, %p2544_p4  ;;  %p2370_p1 = scmp.lt.s32.totalorder %s3193_s29, %s2368_s22 }
  0x36   : > { %816 = vmatpush1.bf16.msra.mxu0 %v795_v16  ;;  %2194 = vmatpush1.bf16.msra.mxu1 %v795_v16 }
  0x37   : > { %p2366_p0 = pneg %p2365_p13 }
  0x39   : > { %830 = vmatmul.mubr.bf16.vlgmr.msra.gmra.mrb[0].mxu0 %v2267_v17  ;;  %958 = vmatmul.mubr.bf16.vlgmr.msra.gmra.mrb[0].mxu1 %v2291_v19 }
  0x3a   : > { %2011 = vmatprep.mubr.msk.bf16.mxu0 %vm693_vm0, %v2270_v18  ;;  %2027 = vmatprep.mubr.msk.bf16.mxu1 %vm693_vm0, %v2297_v20 }
  0x41   : > { %838 = vmatmul.mubr.bf16.gmra.mrb[4].mxu0 %v2272_v21  ;;  %966 = vmatmul.mubr.bf16.gmra.mrb[4].mxu1 %v2299_v23 }
  0x42   : > { %2012 = vmatprep.mubr.msk.bf16.mxu0 %vm693_vm0, %v2273_v22  ;;  %2028 = vmatprep.mubr.msk.bf16.mxu1 %vm693_vm0, %v2303_v24 }
  0x49   : > { %846 = vmatmul.mubr.bf16.gmra.mrb[8].mxu0 %v2275_v25  ;;  %974 = vmatmul.mubr.bf16.gmra.mrb[8].mxu1 %v2305_v27 }
  0x4a   : > { %2013 = vmatprep.mubr.msk.bf16.mxu0 %vm693_vm0, %v2276_v26  ;;  %2029 = vmatprep.mubr.msk.bf16.mxu1 %vm693_vm0, %v2309_v28 }
  0x51   : > { %854 = vmatmul.mubr.bf16.gmra.mrb[12].mxu0 %v2278_v29  ;;  %982 = vmatmul.mubr.bf16.gmra.mrb[12].mxu1 %v2311_v30 }
  0x52   : > { %2014 = vmatprep.mubr.msk.bf16.mxu0 %vm693_vm0, %v2279_v31  ;;  %2030 = vmatprep.mubr.msk.bf16.mxu1 %vm693_vm0, %v2315_v32 }
  0x59   : > { %862 = vmatmul.mubr.bf16.gmra.mrb[16].mxu0 %v2281_v33  ;;  %990 = vmatmul.mubr.bf16.gmra.mrb[16].mxu1 %v2317_v34 }
  0x5a   : > { %2015 = vmatprep.mubr.msk.bf16.mxu0 %vm693_vm0, %v2282_v35  ;;  %2031 = vmatprep.mubr.msk.bf16.mxu1 %vm693_vm0, %v2321_v36 }
  0x61   : > { %870 = vmatmul.mubr.bf16.gmra.mrb[20].mxu0 %v2284_v37  ;;  %998 = vmatmul.mubr.bf16.gmra.mrb[20].mxu1 %v2323_v38 }
  0x62   : > { %2016 = vmatprep.mubr.msk.bf16.mxu0 %vm693_vm0, %v2285_v39  ;;  %2032 = vmatprep.mubr.msk.bf16.mxu1 %vm693_vm0, %v2327_v40 }
  0x69   : > { %878 = vmatmul.mubr.bf16.gmra.mrb[24].mxu0 %v2287_v41  ;;  %1006 = vmatmul.mubr.bf16.gmra.mrb[24].mxu1 %v2329_v42 }
  0x6a   : > { %2017 = vmatprep.mubr.msk.bf16.mxu0 %vm693_vm0, %v2288_v43  ;;  %2033 = vmatprep.mubr.msk.bf16.mxu1 %vm693_vm0, %v2333_v44 }
  0x71   : > { %886 = vmatmul.mubr.bf16.gmra.mrb[28].mxu0 %v2290_v45  ;;  %1014 = vmatmul.mubr.bf16.gmra.mrb[28].mxu1 %v2335_v46 }
  0x72   : > { %2018 = vmatprep.mubr.msk.bf16.mxu0 %vm693_vm0, %v2294_v47  ;;  %2034 = vmatprep.mubr.msk.bf16.mxu1 %vm693_vm0, %v2339_v48 }
  0x79   : > { %894 = vmatmul.mubr.bf16.gmra.mrb[32].mxu0 %v2296_v49  ;;  %1022 = vmatmul.mubr.bf16.gmra.mrb[32].mxu1 %v2341_v50 }
  0x7a   : > { %2019 = vmatprep.mubr.msk.bf16.mxu0 %vm693_vm0, %v2300_v51  ;;  %2035 = vmatprep.mubr.msk.bf16.mxu1 %vm693_vm0, %v2342_v52 }
  0x81   : > { %902 = vmatmul.mubr.bf16.gmra.mrb[36].mxu0 %v2302_v53  ;;  %1030 = vmatmul.mubr.bf16.gmra.mrb[36].mxu1 %v2344_v54 }
  0x82   : > { %2020 = vmatprep.mubr.msk.bf16.mxu0 %vm693_vm0, %v2306_v55  ;;  %2036 = vmatprep.mubr.msk.bf16.mxu1 %vm693_vm0, %v2345_v56 }
  0x89   : > { %910 = vmatmul.mubr.bf16.gmra.mrb[40].mxu0 %v2308_v57  ;;  %1038 = vmatmul.mubr.bf16.gmra.mrb[40].mxu1 %v2347_v58 }
  0x8a   : > { %2021 = vmatprep.mubr.msk.bf16.mxu0 %vm693_vm0, %v2312_v59  ;;  %2037 = vmatprep.mubr.msk.bf16.mxu1 %vm693_vm0, %v2348_v60 }
  0x91   : > { %918 = vmatmul.mubr.bf16.gmra.mrb[44].mxu0 %v2314_v61  ;;  %1046 = vmatmul.mubr.bf16.gmra.mrb[44].mxu1 %v2350_v62 }
  0x92   : > { %2022 = vmatprep.mubr.msk.bf16.mxu0 %vm693_vm0, %v2318_v63  ;;  %2038 = vmatprep.mubr.msk.bf16.mxu1 %vm693_vm0, %v2351_v0 }
  0x99   : > { %926 = vmatmul.mubr.bf16.gmra.mrb[48].mxu0 %v2320_v1  ;;  %1054 = vmatmul.mubr.bf16.gmra.mrb[48].mxu1 %v2353_v2 }
  0x9a   : > { %2023 = vmatprep.mubr.msk.bf16.mxu0 %vm693_vm0, %v2324_v3  ;;  %2039 = vmatprep.mubr.msk.bf16.mxu1 %vm693_vm0, %v2354_v4 }
  0xa1   : > { %934 = vmatmul.mubr.bf16.gmra.mrb[52].mxu0 %v2326_v5  ;;  %1062 = vmatmul.mubr.bf16.gmra.mrb[52].mxu1 %v2356_v6 }
  0xa2   : > { %2024 = vmatprep.mubr.msk.bf16.mxu0 %vm693_vm0, %v2330_v7  ;;  %2040 = vmatprep.mubr.msk.bf16.mxu1 %vm693_vm0, %v2357_v8 }
  0xa9   : > { %942 = vmatmul.mubr.bf16.gmra.mrb[56].mxu0 %v2332_v9  ;;  %1070 = vmatmul.mubr.bf16.gmra.mrb[56].mxu1 %v2359_v10 }
  0xaa   : > { %2025 = vmatprep.mubr.msk.bf16.mxu0 %vm693_vm0, %v2336_v11  ;;  %2041 = vmatprep.mubr.msk.bf16.mxu1 %vm693_vm0, %v2360_v12 }
  0xb1   : > { %950 = vmatmul.mubr.bf16.gmra.mrb[60].mxu0 %v2338_v13  ;;  %1078 = vmatmul.mubr.bf16.gmra.mrb[60].mxu1 %v2362_v14 }
 0x10c   : > { %v831_v15 = vpop.f32.mrb[0].mxu0  ;;  %v2700_v16 = vpop.f32.mrb[0].mxu1 }
 0x10d   : > { %v2111_v17 = vpack.c.bf16 %v831_v15, %v831_v15  ;;  %v1543_v18 = vmul.f32 %v831_v15, %v831_v15  ;;  %v833_v19 = vpop.f32.mrb[1].mxu0  ;;  %v2143_v20 = vpack.c.bf16 %v2700_v16, %v2700_v16  ;;  %v961_v21 = vpop.f32.mrb[1].mxu1  ;;  %v1408_v24 = vsel %vm1407_vm4, %v831_v15, 0.0 }
 0x10e   : > { %v834_v22 = vpop.f32.mrb[2].mxu0  ;;  %v2704_v23 = vpop.f32.mrb[2].mxu1 }
 0x10f   : > { %1343 = vst.msk [vmem:[%s2698_s24] sm:$0xf] %vm1342_vm3, %v2111_v17  ;;  %v2112_v25 = vpack.c.bf16 %v834_v22, %v834_v22  ;;  %v1409_v26 = vsel %vm1407_vm4, %v834_v22, 0.0  ;;  %v1544_v27 = vmul.f32 %v834_v22, %v834_v22  ;;  %v836_v28 = vpop.f32.mrb[3].mxu0  ;;  %1375 = vst.msk [vmem:[%s2698_s24 + $0x80] sm:$0xf] %vm1342_vm3, %v2143_v20  ;;  %v2144_v31 = vpack.c.bf16 %v2704_v23, %v2704_v23 }
 0x110   : > { %v964_v29 = vpop.f32.mrb[3].mxu1  ;;  %v1410_v30 = vadd.f32 %v1409_v26, %v1408_v24  ;;  %v1607_v32 = vsel %vm1407_vm4, %v1543_v18, 0.0 }
 0x111   : > { %1344 = vst.msk [vmem:[%s2698_s24 + $0x4] sm:$0xf] %vm1342_vm3, %v2112_v25  ;;  %v1608_v33 = vsel %vm1407_vm4, %v1544_v27, 0.0  ;;  %1376 = vst.msk [vmem:[%s2698_s24 + $0x84] sm:$0xf] %vm1342_vm3, %v2144_v31 }
 0x112   : > { %v1609_v34 = vadd.f32 %v1608_v33, %v1607_v32 }
 0x114   : > { %v839_v35 = vpop.f32.mrb[4].mxu0  ;;  %v2720_v36 = vpop.f32.mrb[4].mxu1 }
 0x115   : > { %v2113_v37 = vpack.c.bf16 %v839_v35, %v839_v35  ;;  %v1411_v38 = vsel %vm1407_vm4, %v839_v35, 0.0  ;;  %v1545_v39 = vmul.f32 %v839_v35, %v839_v35  ;;  %v841_v40 = vpop.f32.mrb[5].mxu0  ;;  %v2145_v41 = vpack.c.bf16 %v2720_v36, %v2720_v36  ;;  %v969_v42 = vpop.f32.mrb[5].mxu1 }
 0x116   : > { %v1412_v43 = vadd.f32 %v1411_v38, %v1410_v30  ;;  %v842_v44 = vpop.f32.mrb[6].mxu0  ;;  %v2725_v45 = vpop.f32.mrb[6].mxu1 }
 0x117   : > { %1345 = vst.msk [vmem:[%s2698_s24 + $0x8] sm:$0xf] %vm1342_vm3, %v2113_v37  ;;  %v1610_v46 = vsel %vm1407_vm4, %v1545_v39, 0.0  ;;  %v2114_v47 = vpack.c.bf16 %v842_v44, %v842_v44  ;;  %v1413_v48 = vsel %vm1407_vm4, %v842_v44, 0.0  ;;  %v1546_v49 = vmul.f32 %v842_v44, %v842_v44  ;;  %v844_v50 = vpop.f32.mrb[7].mxu0  ;;  %v972_v51 = vpop.f32.mrb[7].mxu1 }
 0x118   : > { %1377 = vst.msk [vmem:[%s2698_s24 + $0x88] sm:$0xf] %vm1342_vm3, %v2145_v41  ;;  %v1611_v52 = vadd.f32 %v1610_v46, %v1609_v34  ;;  %v1414_v53 = vadd.f32 %v1413_v48, %v1412_v43  ;;  %v2146_v54 = vpack.c.bf16 %v2725_v45, %v2725_v45 }
 0x119   : > { %1346 = vst.msk [vmem:[%s2698_s24 + $0xc] sm:$0xf] %vm1342_vm3, %v2114_v47  ;;  %v1612_v55 = vsel %vm1407_vm4, %v1546_v49, 0.0 }
 0x11a   : > { %v1613_v56 = vadd.f32 %v1612_v55, %v1611_v52  ;;  %1378 = vst.msk [vmem:[%s2698_s24 + $0x8c] sm:$0xf] %vm1342_vm3, %v2146_v54 }
 0x11c   : > { %v847_v57 = vpop.f32.mrb[8].mxu0  ;;  %v2740_v58 = vpop.f32.mrb[8].mxu1 }
 0x11d   : > { %v2115_v59 = vpack.c.bf16 %v847_v57, %v847_v57  ;;  %v1415_v60 = vsel %vm1407_vm4, %v847_v57, 0.0  ;;  %v1547_v61 = vmul.f32 %v847_v57, %v847_v57  ;;  %v849_v62 = vpop.f32.mrb[9].mxu0  ;;  %v2147_v63 = vpack.c.bf16 %v2740_v58, %v2740_v58  ;;  %v977_v0 = vpop.f32.mrb[9].mxu1 }
 0x11e   : > { %v1416_v1 = vadd.f32 %v1415_v60, %v1414_v53  ;;  %v850_v2 = vpop.f32.mrb[10].mxu0  ;;  %v2745_v3 = vpop.f32.mrb[10].mxu1 }
 0x11f   : > { %1347 = vst.msk [vmem:[%s2698_s24 + $0x10] sm:$0xf] %vm1342_vm3, %v2115_v59  ;;  %v1614_v4 = vsel %vm1407_vm4, %v1547_v61, 0.0  ;;  %v2116_v5 = vpack.c.bf16 %v850_v2, %v850_v2  ;;  %v1417_v6 = vsel %vm1407_vm4, %v850_v2, 0.0  ;;  %v1548_v7 = vmul.f32 %v850_v2, %v850_v2  ;;  %v852_v8 = vpop.f32.mrb[11].mxu0  ;;  %v980_v9 = vpop.f32.mrb[11].mxu1 }
 0x120   : > { %1379 = vst.msk [vmem:[%s2698_s24 + $0x90] sm:$0xf] %vm1342_vm3, %v2147_v63  ;;  %v1615_v10 = vadd.f32 %v1614_v4, %v1613_v56  ;;  %v1418_v11 = vadd.f32 %v1417_v6, %v1416_v1  ;;  %v2148_v12 = vpack.c.bf16 %v2745_v3, %v2745_v3 }
 0x121   : > { %1348 = vst.msk [vmem:[%s2698_s24 + $0x14] sm:$0xf] %vm1342_vm3, %v2116_v5  ;;  %v1616_v13 = vsel %vm1407_vm4, %v1548_v7, 0.0 }
 0x122   : > { %v1617_v14 = vadd.f32 %v1616_v13, %v1615_v10  ;;  %1380 = vst.msk [vmem:[%s2698_s24 + $0x94] sm:$0xf] %vm1342_vm3, %v2148_v12 }
 0x124   : > { %v855_v15 = vpop.f32.mrb[12].mxu0  ;;  %v2760_v17 = vpop.f32.mrb[12].mxu1 }
 0x125   : > { %v2117_v18 = vpack.c.bf16 %v855_v15, %v855_v15  ;;  %v1419_v19 = vsel %vm1407_vm4, %v855_v15, 0.0  ;;  %v1549_v20 = vmul.f32 %v855_v15, %v855_v15  ;;  %v857_v21 = vpop.f32.mrb[13].mxu0  ;;  %v2149_v22 = vpack.c.bf16 %v2760_v17, %v2760_v17  ;;  %v985_v24 = vpop.f32.mrb[13].mxu1 }
 0x126   : > { %v1420_v25 = vadd.f32 %v1419_v19, %v1418_v11  ;;  %v858_v26 = vpop.f32.mrb[14].mxu0  ;;  %v2765_v27 = vpop.f32.mrb[14].mxu1 }
 0x127   : > { %1349 = vst.msk [vmem:[%s2698_s24 + $0x18] sm:$0xf] %vm1342_vm3, %v2117_v18  ;;  %v1618_v28 = vsel %vm1407_vm4, %v1549_v20, 0.0  ;;  %v2118_v29 = vpack.c.bf16 %v858_v26, %v858_v26  ;;  %v1421_v30 = vsel %vm1407_vm4, %v858_v26, 0.0  ;;  %v1550_v31 = vmul.f32 %v858_v26, %v858_v26  ;;  %v860_v32 = vpop.f32.mrb[15].mxu0  ;;  %v988_v33 = vpop.f32.mrb[15].mxu1 }
 0x128   : > { %1381 = vst.msk [vmem:[%s2698_s24 + $0x98] sm:$0xf] %vm1342_vm3, %v2149_v22  ;;  %v1619_v34 = vadd.f32 %v1618_v28, %v1617_v14  ;;  %v1422_v35 = vadd.f32 %v1421_v30, %v1420_v25  ;;  %v2150_v37 = vpack.c.bf16 %v2765_v27, %v2765_v27 }
 0x129   : > { %1350 = vst.msk [vmem:[%s2698_s24 + $0x1c] sm:$0xf] %vm1342_vm3, %v2118_v29  ;;  %v1620_v38 = vsel %vm1407_vm4, %v1550_v31, 0.0 }
 0x12a   : > { %v1621_v39 = vadd.f32 %v1620_v38, %v1619_v34  ;;  %1382 = vst.msk [vmem:[%s2698_s24 + $0x9c] sm:$0xf] %vm1342_vm3, %v2150_v37 }
 0x12c   : > { %v863_v40 = vpop.f32.mrb[16].mxu0  ;;  %v2780_v41 = vpop.f32.mrb[16].mxu1 }
 0x12d   : > { %v2119_v42 = vpack.c.bf16 %v863_v40, %v863_v40  ;;  %v1423_v43 = vsel %vm1407_vm4, %v863_v40, 0.0  ;;  %v1551_v44 = vmul.f32 %v863_v40, %v863_v40  ;;  %v865_v46 = vpop.f32.mrb[17].mxu0  ;;  %v2151_v47 = vpack.c.bf16 %v2780_v41, %v2780_v41  ;;  %v993_v48 = vpop.f32.mrb[17].mxu1 }
 0x12e   : > { %v1424_v49 = vadd.f32 %v1423_v43, %v1422_v35  ;;  %v866_v50 = vpop.f32.mrb[18].mxu0  ;;  %v2785_v51 = vpop.f32.mrb[18].mxu1 }
 0x12f   : > { %1351 = vst.msk [vmem:[%s2698_s24 + $0x20] sm:$0xf] %vm1342_vm3, %v2119_v42  ;;  %v1622_v52 = vsel %vm1407_vm4, %v1551_v44, 0.0  ;;  %v2120_v53 = vpack.c.bf16 %v866_v50, %v866_v50  ;;  %v1425_v54 = vsel %vm1407_vm4, %v866_v50, 0.0  ;;  %v1552_v55 = vmul.f32 %v866_v50, %v866_v50  ;;  %v868_v56 = vpop.f32.mrb[19].mxu0  ;;  %v996_v57 = vpop.f32.mrb[19].mxu1 }
 0x130   : > { %1383 = vst.msk [vmem:[%s2698_s24 + $0xa0] sm:$0xf] %vm1342_vm3, %v2151_v47  ;;  %v1623_v59 = vadd.f32 %v1622_v52, %v1621_v39  ;;  %v1426_v60 = vadd.f32 %v1425_v54, %v1424_v49  ;;  %v2152_v61 = vpack.c.bf16 %v2785_v51, %v2785_v51 }
 0x131   : > { %1352 = vst.msk [vmem:[%s2698_s24 + $0x24] sm:$0xf] %vm1342_vm3, %v2120_v53  ;;  %v1624_v62 = vsel %vm1407_vm4, %v1552_v55, 0.0 }
 0x132   : > { %v1625_v63 = vadd.f32 %v1624_v62, %v1623_v59  ;;  %1384 = vst.msk [vmem:[%s2698_s24 + $0xa4] sm:$0xf] %vm1342_vm3, %v2152_v61 }
 0x134   : > { %v871_v0 = vpop.f32.mrb[20].mxu0  ;;  %v2800_v1 = vpop.f32.mrb[20].mxu1 }
 0x135   : > { %v2121_v2 = vpack.c.bf16 %v871_v0, %v871_v0  ;;  %v1427_v4 = vsel %vm1407_vm4, %v871_v0, 0.0  ;;  %v1553_v5 = vmul.f32 %v871_v0, %v871_v0  ;;  %v873_v6 = vpop.f32.mrb[21].mxu0  ;;  %v2153_v7 = vpack.c.bf16 %v2800_v1, %v2800_v1  ;;  %v1001_v8 = vpop.f32.mrb[21].mxu1 }
 0x136   : > { %v1428_v9 = vadd.f32 %v1427_v4, %v1426_v60  ;;  %v874_v10 = vpop.f32.mrb[22].mxu0  ;;  %v2805_v11 = vpop.f32.mrb[22].mxu1 }
 0x137   : > { %1353 = vst.msk [vmem:[%s2698_s24 + $0x28] sm:$0xf] %vm1342_vm3, %v2121_v2  ;;  %v1626_v12 = vsel %vm1407_vm4, %v1553_v5, 0.0  ;;  %v2122_v13 = vpack.c.bf16 %v874_v10, %v874_v10  ;;  %v1429_v14 = vsel %vm1407_vm4, %v874_v10, 0.0  ;;  %v1554_v15 = vmul.f32 %v874_v10, %v874_v10  ;;  %v876_v18 = vpop.f32.mrb[23].mxu0  ;;  %v1004_v19 = vpop.f32.mrb[23].mxu1 }
 0x138   : > { %1385 = vst.msk [vmem:[%s2698_s24 + $0xa8] sm:$0xf] %vm1342_vm3, %v2153_v7  ;;  %v1627_v20 = vadd.f32 %v1626_v12, %v1625_v63  ;;  %v1430_v21 = vadd.f32 %v1429_v14, %v1428_v9  ;;  %v2154_v22 = vpack.c.bf16 %v2805_v11, %v2805_v11 }
 0x139   : > { %1354 = vst.msk [vmem:[%s2698_s24 + $0x2c] sm:$0xf] %vm1342_vm3, %v2122_v13  ;;  %v1628_v24 = vsel %vm1407_vm4, %v1554_v15, 0.0 }
 0x13a   : > { %v1629_v25 = vadd.f32 %v1628_v24, %v1627_v20  ;;  %1386 = vst.msk [vmem:[%s2698_s24 + $0xac] sm:$0xf] %vm1342_vm3, %v2154_v22 }
 0x13c   : > { %v879_v26 = vpop.f32.mrb[24].mxu0  ;;  %v2820_v28 = vpop.f32.mrb[24].mxu1 }
 0x13d   : > { %v2123_v29 = vpack.c.bf16 %v879_v26, %v879_v26  ;;  %v1431_v30 = vsel %vm1407_vm4, %v879_v26, 0.0  ;;  %v1555_v31 = vmul.f32 %v879_v26, %v879_v26  ;;  %v881_v32 = vpop.f32.mrb[25].mxu0  ;;  %v2155_v33 = vpack.c.bf16 %v2820_v28, %v2820_v28  ;;  %v1009_v34 = vpop.f32.mrb[25].mxu1 }
 0x13e   : > { %v1432_v35 = vadd.f32 %v1431_v30, %v1430_v21  ;;  %v882_v37 = vpop.f32.mrb[26].mxu0  ;;  %v2825_v38 = vpop.f32.mrb[26].mxu1 }
 0x13f   : > { %1355 = vst.msk [vmem:[%s2698_s24 + $0x30] sm:$0xf] %vm1342_vm3, %v2123_v29  ;;  %v1630_v39 = vsel %vm1407_vm4, %v1555_v31, 0.0  ;;  %v2124_v40 = vpack.c.bf16 %v882_v37, %v882_v37  ;;  %v1433_v42 = vsel %vm1407_vm4, %v882_v37, 0.0  ;;  %v1556_v43 = vmul.f32 %v882_v37, %v882_v37  ;;  %v884_v44 = vpop.f32.mrb[27].mxu0  ;;  %v1012_v46 = vpop.f32.mrb[27].mxu1 }
 0x140   : > { %1387 = vst.msk [vmem:[%s2698_s24 + $0xb0] sm:$0xf] %vm1342_vm3, %v2155_v33  ;;  %v1631_v47 = vadd.f32 %v1630_v39, %v1629_v25  ;;  %v1434_v48 = vadd.f32 %v1433_v42, %v1432_v35  ;;  %v2156_v49 = vpack.c.bf16 %v2825_v38, %v2825_v38 }
 0x141   : > { %1356 = vst.msk [vmem:[%s2698_s24 + $0x34] sm:$0xf] %vm1342_vm3, %v2124_v40  ;;  %v1632_v50 = vsel %vm1407_vm4, %v1556_v43, 0.0 }
 0x142   : > { %v1633_v52 = vadd.f32 %v1632_v50, %v1631_v47  ;;  %1388 = vst.msk [vmem:[%s2698_s24 + $0xb4] sm:$0xf] %vm1342_vm3, %v2156_v49 }
 0x144   : > { %v887_v53 = vpop.f32.mrb[28].mxu0  ;;  %v2840_v54 = vpop.f32.mrb[28].mxu1 }
 0x145   : > { %v2125_v55 = vpack.c.bf16 %v887_v53, %v887_v53  ;;  %v1435_v56 = vsel %vm1407_vm4, %v887_v53, 0.0  ;;  %v1557_v57 = vmul.f32 %v887_v53, %v887_v53  ;;  %v889_v59 = vpop.f32.mrb[29].mxu0  ;;  %v2157_v60 = vpack.c.bf16 %v2840_v54, %v2840_v54  ;;  %v1017_v61 = vpop.f32.mrb[29].mxu1 }
 0x146   : > { %v1436_v62 = vadd.f32 %v1435_v56, %v1434_v48  ;;  %v890_v63 = vpop.f32.mrb[30].mxu0  ;;  %v2845_v0 = vpop.f32.mrb[30].mxu1 }
 0x147   : > { %1357 = vst.msk [vmem:[%s2698_s24 + $0x38] sm:$0xf] %vm1342_vm3, %v2125_v55  ;;  %v1634_v2 = vsel %vm1407_vm4, %v1557_v57, 0.0  ;;  %v2126_v4 = vpack.c.bf16 %v890_v63, %v890_v63  ;;  %v1437_v5 = vsel %vm1407_vm4, %v890_v63, 0.0  ;;  %v1558_v6 = vmul.f32 %v890_v63, %v890_v63  ;;  %v892_v7 = vpop.f32.mrb[31].mxu0  ;;  %v1020_v8 = vpop.f32.mrb[31].mxu1 }
 0x148   : > { %1389 = vst.msk [vmem:[%s2698_s24 + $0xb8] sm:$0xf] %vm1342_vm3, %v2157_v60  ;;  %v1635_v9 = vadd.f32 %v1634_v2, %v1633_v52  ;;  %v1438_v10 = vadd.f32 %v1437_v5, %v1436_v62  ;;  %v2158_v12 = vpack.c.bf16 %v2845_v0, %v2845_v0 }
 0x149   : > { %1358 = vst.msk [vmem:[%s2698_s24 + $0x3c] sm:$0xf] %vm1342_vm3, %v2126_v4  ;;  %v1636_v13 = vsel %vm1407_vm4, %v1558_v6, 0.0 }
 0x14a   : > { %v1637_v14 = vadd.f32 %v1636_v13, %v1635_v9  ;;  %1390 = vst.msk [vmem:[%s2698_s24 + $0xbc] sm:$0xf] %vm1342_vm3, %v2158_v12 }
 0x14c   : > { %v895_v15 = vpop.f32.mrb[32].mxu0  ;;  %v2860_v18 = vpop.f32.mrb[32].mxu1 }
 0x14d   : > { %v2127_v19 = vpack.c.bf16 %v895_v15, %v895_v15  ;;  %v1439_v20 = vsel %vm1407_vm4, %v895_v15, 0.0  ;;  %v1559_v21 = vmul.f32 %v895_v15, %v895_v15  ;;  %v897_v22 = vpop.f32.mrb[33].mxu0  ;;  %v2159_v24 = vpack.c.bf16 %v2860_v18, %v2860_v18  ;;  %v1025_v25 = vpop.f32.mrb[33].mxu1 }
 0x14e   : > { %v1440_v26 = vadd.f32 %v1439_v20, %v1438_v10  ;;  %v898_v29 = vpop.f32.mrb[34].mxu0  ;;  %v2865_v30 = vpop.f32.mrb[34].mxu1 }
 0x14f   : > { %1359 = vst.msk [vmem:[%s2698_s24 + $0x40] sm:$0xf] %vm1342_vm3, %v2127_v19  ;;  %v1638_v31 = vsel %vm1407_vm4, %v1559_v21, 0.0  ;;  %v2128_v32 = vpack.c.bf16 %v898_v29, %v898_v29  ;;  %v1441_v33 = vsel %vm1407_vm4, %v898_v29, 0.0  ;;  %v1560_v34 = vmul.f32 %v898_v29, %v898_v29  ;;  %v900_v35 = vpop.f32.mrb[35].mxu0  ;;  %v1028_v37 = vpop.f32.mrb[35].mxu1 }
 0x150   : > { %1391 = vst.msk [vmem:[%s2698_s24 + $0xc0] sm:$0xf] %vm1342_vm3, %v2159_v24  ;;  %v1639_v39 = vadd.f32 %v1638_v31, %v1637_v14  ;;  %v1442_v40 = vadd.f32 %v1441_v33, %v1440_v26  ;;  %v2160_v42 = vpack.c.bf16 %v2865_v30, %v2865_v30 }
 0x151   : > { %1360 = vst.msk [vmem:[%s2698_s24 + $0x44] sm:$0xf] %vm1342_vm3, %v2128_v32  ;;  %v1640_v43 = vsel %vm1407_vm4, %v1560_v34, 0.0 }
 0x152   : > { %v1641_v44 = vadd.f32 %v1640_v43, %v1639_v39  ;;  %1392 = vst.msk [vmem:[%s2698_s24 + $0xc4] sm:$0xf] %vm1342_vm3, %v2160_v42 }
 0x154   : > { %v903_v46 = vpop.f32.mrb[36].mxu0  ;;  %v2880_v47 = vpop.f32.mrb[36].mxu1 }
 0x155   : > { %v2129_v48 = vpack.c.bf16 %v903_v46, %v903_v46  ;;  %v1443_v49 = vsel %vm1407_vm4, %v903_v46, 0.0  ;;  %v1561_v50 = vmul.f32 %v903_v46, %v903_v46  ;;  %v905_v52 = vpop.f32.mrb[37].mxu0  ;;  %v2161_v53 = vpack.c.bf16 %v2880_v47, %v2880_v47  ;;  %v1033_v55 = vpop.f32.mrb[37].mxu1 }
 0x156   : > { %v1444_v56 = vadd.f32 %v1443_v49, %v1442_v40  ;;  %v906_v57 = vpop.f32.mrb[38].mxu0  ;;  %v2885_v59 = vpop.f32.mrb[38].mxu1 }
 0x157   : > { %1361 = vst.msk [vmem:[%s2698_s24 + $0x48] sm:$0xf] %vm1342_vm3, %v2129_v48  ;;  %v1642_v60 = vsel %vm1407_vm4, %v1561_v50, 0.0  ;;  %v2130_v61 = vpack.c.bf16 %v906_v57, %v906_v57  ;;  %v1445_v62 = vsel %vm1407_vm4, %v906_v57, 0.0  ;;  %v1562_v63 = vmul.f32 %v906_v57, %v906_v57  ;;  %v908_v2 = vpop.f32.mrb[39].mxu0  ;;  %v1036_v4 = vpop.f32.mrb[39].mxu1 }
 0x158   : > { %1393 = vst.msk [vmem:[%s2698_s24 + $0xc8] sm:$0xf] %vm1342_vm3, %v2161_v53  ;;  %v1643_v5 = vadd.f32 %v1642_v60, %v1641_v44  ;;  %v1446_v6 = vadd.f32 %v1445_v62, %v1444_v56  ;;  %v2162_v7 = vpack.c.bf16 %v2885_v59, %v2885_v59 }
 0x159   : > { %1362 = vst.msk [vmem:[%s2698_s24 + $0x4c] sm:$0xf] %vm1342_vm3, %v2130_v61  ;;  %v1644_v8 = vsel %vm1407_vm4, %v1562_v63, 0.0 }
 0x15a   : > { %v1645_v9 = vadd.f32 %v1644_v8, %v1643_v5  ;;  %1394 = vst.msk [vmem:[%s2698_s24 + $0xcc] sm:$0xf] %vm1342_vm3, %v2162_v7 }
 0x15c   : > { %v911_v10 = vpop.f32.mrb[40].mxu0  ;;  %v2900_v12 = vpop.f32.mrb[40].mxu1 }
 0x15d   : > { %v2131_v13 = vpack.c.bf16 %v911_v10, %v911_v10  ;;  %v1447_v14 = vsel %vm1407_vm4, %v911_v10, 0.0  ;;  %v1563_v15 = vmul.f32 %v911_v10, %v911_v10  ;;  %v913_v19 = vpop.f32.mrb[41].mxu0  ;;  %v2163_v20 = vpack.c.bf16 %v2900_v12, %v2900_v12  ;;  %v1041_v21 = vpop.f32.mrb[41].mxu1 }
 0x15e   : > { %v1448_v22 = vadd.f32 %v1447_v14, %v1446_v6  ;;  %v914_v24 = vpop.f32.mrb[42].mxu0  ;;  %v2905_v25 = vpop.f32.mrb[42].mxu1 }
 0x15f   : > { %1363 = vst.msk [vmem:[%s2698_s24 + $0x50] sm:$0xf] %vm1342_vm3, %v2131_v13  ;;  %v1646_v26 = vsel %vm1407_vm4, %v1563_v15, 0.0  ;;  %v2132_v29 = vpack.c.bf16 %v914_v24, %v914_v24  ;;  %v1449_v31 = vsel %vm1407_vm4, %v914_v24, 0.0  ;;  %v1564_v32 = vmul.f32 %v914_v24, %v914_v24  ;;  %v916_v33 = vpop.f32.mrb[43].mxu0  ;;  %v1044_v34 = vpop.f32.mrb[43].mxu1 }
 0x160   : > { %1395 = vst.msk [vmem:[%s2698_s24 + $0xd0] sm:$0xf] %vm1342_vm3, %v2163_v20  ;;  %v1647_v35 = vadd.f32 %v1646_v26, %v1645_v9  ;;  %v1450_v37 = vadd.f32 %v1449_v31, %v1448_v22  ;;  %v2164_v39 = vpack.c.bf16 %v2905_v25, %v2905_v25 }
 0x161   : > { %1364 = vst.msk [vmem:[%s2698_s24 + $0x54] sm:$0xf] %vm1342_vm3, %v2132_v29  ;;  %v1648_v40 = vsel %vm1407_vm4, %v1564_v32, 0.0 }
 0x162   : > { %v1649_v42 = vadd.f32 %v1648_v40, %v1647_v35  ;;  %1396 = vst.msk [vmem:[%s2698_s24 + $0xd4] sm:$0xf] %vm1342_vm3, %v2164_v39 }
 0x164   : > { %v919_v43 = vpop.f32.mrb[44].mxu0  ;;  %v2920_v44 = vpop.f32.mrb[44].mxu1 }
 0x165   : > { %v2133_v46 = vpack.c.bf16 %v919_v43, %v919_v43  ;;  %v1451_v48 = vsel %vm1407_vm4, %v919_v43, 0.0  ;;  %v1565_v49 = vmul.f32 %v919_v43, %v919_v43  ;;  %v921_v50 = vpop.f32.mrb[45].mxu0  ;;  %v2165_v52 = vpack.c.bf16 %v2920_v44, %v2920_v44  ;;  %v1049_v53 = vpop.f32.mrb[45].mxu1 }
 0x166   : > { %v1452_v55 = vadd.f32 %v1451_v48, %v1450_v37  ;;  %v922_v56 = vpop.f32.mrb[46].mxu0  ;;  %v2925_v57 = vpop.f32.mrb[46].mxu1 }
 0x167   : > { %1365 = vst.msk [vmem:[%s2698_s24 + $0x58] sm:$0xf] %vm1342_vm3, %v2133_v46  ;;  %v1650_v60 = vsel %vm1407_vm4, %v1565_v49, 0.0  ;;  %v2134_v61 = vpack.c.bf16 %v922_v56, %v922_v56  ;;  %v1453_v62 = vsel %vm1407_vm4, %v922_v56, 0.0  ;;  %v1566_v63 = vmul.f32 %v922_v56, %v922_v56  ;;  %v924_v2 = vpop.f32.mrb[47].mxu0  ;;  %v1052_v4 = vpop.f32.mrb[47].mxu1 }
 0x168   : > { %1397 = vst.msk [vmem:[%s2698_s24 + $0xd8] sm:$0xf] %vm1342_vm3, %v2165_v52  ;;  %v1651_v5 = vadd.f32 %v1650_v60, %v1649_v42  ;;  %v1454_v6 = vadd.f32 %v1453_v62, %v1452_v55  ;;  %v2166_v7 = vpack.c.bf16 %v2925_v57, %v2925_v57 }
 0x169   : > { %1366 = vst.msk [vmem:[%s2698_s24 + $0x5c] sm:$0xf] %vm1342_vm3, %v2134_v61  ;;  %v1652_v8 = vsel %vm1407_vm4, %v1566_v63, 0.0 }
 0x16a   : > { %v1653_v9 = vadd.f32 %v1652_v8, %v1651_v5  ;;  %1398 = vst.msk [vmem:[%s2698_s24 + $0xdc] sm:$0xf] %vm1342_vm3, %v2166_v7 }
 0x16c   : > { %v927_v10 = vpop.f32.mrb[48].mxu0  ;;  %v2940_v13 = vpop.f32.mrb[48].mxu1 }
 0x16d   : > { %v2135_v14 = vpack.c.bf16 %v927_v10, %v927_v10  ;;  %v1455_v15 = vsel %vm1407_vm4, %v927_v10, 0.0  ;;  %v1567_v19 = vmul.f32 %v927_v10, %v927_v10  ;;  %v929_v20 = vpop.f32.mrb[49].mxu0  ;;  %v2167_v21 = vpack.c.bf16 %v2940_v13, %v2940_v13  ;;  %v1057_v22 = vpop.f32.mrb[49].mxu1 }
 0x16e   : > { %v1456_v24 = vadd.f32 %v1455_v15, %v1454_v6  ;;  %v930_v26 = vpop.f32.mrb[50].mxu0  ;;  %v2945_v29 = vpop.f32.mrb[50].mxu1 }
 0x16f   : > { %1367 = vst.msk [vmem:[%s2698_s24 + $0x60] sm:$0xf] %vm1342_vm3, %v2135_v14  ;;  %v1654_v31 = vsel %vm1407_vm4, %v1567_v19, 0.0  ;;  %v2136_v32 = vpack.c.bf16 %v930_v26, %v930_v26  ;;  %v1457_v33 = vsel %vm1407_vm4, %v930_v26, 0.0  ;;  %v1568_v34 = vmul.f32 %v930_v26, %v930_v26  ;;  %v932_v35 = vpop.f32.mrb[51].mxu0  ;;  %v1060_v37 = vpop.f32.mrb[51].mxu1 }
 0x170   : > { %1399 = vst.msk [vmem:[%s2698_s24 + $0xe0] sm:$0xf] %vm1342_vm3, %v2167_v21  ;;  %v1655_v39 = vadd.f32 %v1654_v31, %v1653_v9  ;;  %v1458_v40 = vadd.f32 %v1457_v33, %v1456_v24  ;;  %v2168_v42 = vpack.c.bf16 %v2945_v29, %v2945_v29 }
 0x171   : > { %1368 = vst.msk [vmem:[%s2698_s24 + $0x64] sm:$0xf] %vm1342_vm3, %v2136_v32  ;;  %v1656_v43 = vsel %vm1407_vm4, %v1568_v34, 0.0 }
 0x172   : > { %v1657_v46 = vadd.f32 %v1656_v43, %v1655_v39  ;;  %1400 = vst.msk [vmem:[%s2698_s24 + $0xe4] sm:$0xf] %vm1342_vm3, %v2168_v42 }
 0x174   : > { %v935_v48 = vpop.f32.mrb[52].mxu0  ;;  %v2960_v49 = vpop.f32.mrb[52].mxu1 }
 0x175   : > { %v2137_v50 = vpack.c.bf16 %v935_v48, %v935_v48  ;;  %v1459_v52 = vsel %vm1407_vm4, %v935_v48, 0.0  ;;  %v1569_v53 = vmul.f32 %v935_v48, %v935_v48  ;;  %v937_v55 = vpop.f32.mrb[53].mxu0  ;;  %v2169_v56 = vpack.c.bf16 %v2960_v49, %v2960_v49  ;;  %v1065_v60 = vpop.f32.mrb[53].mxu1 }
 0x176   : > { %v1460_v61 = vadd.f32 %v1459_v52, %v1458_v40  ;;  %v938_v62 = vpop.f32.mrb[54].mxu0  ;;  %v2965_v63 = vpop.f32.mrb[54].mxu1 }
 0x177   : > { %1369 = vst.msk [vmem:[%s2698_s24 + $0x68] sm:$0xf] %vm1342_vm3, %v2137_v50  ;;  %v1658_v2 = vsel %vm1407_vm4, %v1569_v53, 0.0  ;;  %v2138_v4 = vpack.c.bf16 %v938_v62, %v938_v62  ;;  %v1461_v5 = vsel %vm1407_vm4, %v938_v62, 0.0  ;;  %v1570_v6 = vmul.f32 %v938_v62, %v938_v62  ;;  %v940_v7 = vpop.f32.mrb[55].mxu0  ;;  %v1068_v8 = vpop.f32.mrb[55].mxu1 }
 0x178   : > { %1401 = vst.msk [vmem:[%s2698_s24 + $0xe8] sm:$0xf] %vm1342_vm3, %v2169_v56  ;;  %v1659_v9 = vadd.f32 %v1658_v2, %v1657_v46  ;;  %v1462_v10 = vadd.f32 %v1461_v5, %v1460_v61  ;;  %v2170_v14 = vpack.c.bf16 %v2965_v63, %v2965_v63  ;;  %v1575_v8 = vmul.f32 %v2700_v16, %v2700_v16 }
 0x179   : > { %1370 = vst.msk [vmem:[%s2698_s24 + $0x6c] sm:$0xf] %vm1342_vm3, %v2138_v4  ;;  %v1660_v15 = vsel %vm1407_vm4, %v1570_v6, 0.0 }
 0x17a   : > { %v1661_v19 = vadd.f32 %v1660_v15, %v1659_v9  ;;  %1402 = vst.msk [vmem:[%s2698_s24 + $0xec] sm:$0xf] %vm1342_vm3, %v2170_v14 }
 0x17c   : > { %v943_v20 = vpop.f32.mrb[56].mxu0  ;;  %v2980_v21 = vpop.f32.mrb[56].mxu1 }
 0x17d   : > { %v2139_v22 = vpack.c.bf16 %v943_v20, %v943_v20  ;;  %v1463_v24 = vsel %vm1407_vm4, %v943_v20, 0.0  ;;  %v1571_v26 = vmul.f32 %v943_v20, %v943_v20  ;;  %v945_v31 = vpop.f32.mrb[57].mxu0  ;;  %v2171_v32 = vpack.c.bf16 %v2980_v21, %v2980_v21  ;;  %v1073_v33 = vpop.f32.mrb[57].mxu1 }
 0x17e   : > { %v1464_v34 = vadd.f32 %v1463_v24, %v1462_v10  ;;  %v946_v35 = vpop.f32.mrb[58].mxu0  ;;  %v2985_v37 = vpop.f32.mrb[58].mxu1 }
 0x17f   : > { %1371 = vst.msk [vmem:[%s2698_s24 + $0x70] sm:$0xf] %vm1342_vm3, %v2139_v22  ;;  %v1662_v39 = vsel %vm1407_vm4, %v1571_v26, 0.0  ;;  %v2140_v40 = vpack.c.bf16 %v946_v35, %v946_v35  ;;  %v1465_v42 = vsel %vm1407_vm4, %v946_v35, 0.0  ;;  %v1572_v43 = vmul.f32 %v946_v35, %v946_v35  ;;  %v948_v46 = vpop.f32.mrb[59].mxu0  ;;  %v1076_v48 = vpop.f32.mrb[59].mxu1 }
 0x180   : > { %1403 = vst.msk [vmem:[%s2698_s24 + $0xf0] sm:$0xf] %vm1342_vm3, %v2171_v32  ;;  %v1663_v50 = vadd.f32 %v1662_v39, %v1661_v19  ;;  %v1466_v52 = vadd.f32 %v1465_v42, %v1464_v34  ;;  %v2172_v53 = vpack.c.bf16 %v2985_v37, %v2985_v37  ;;  %v1471_v34 = vsel %vm1407_vm4, %v2700_v16, 0.0 }
 0x181   : > { %1372 = vst.msk [vmem:[%s2698_s24 + $0x74] sm:$0xf] %vm1342_vm3, %v2140_v40  ;;  %v1664_v55 = vsel %vm1407_vm4, %v1572_v43, 0.0  ;;  %v1576_v35 = vmul.f32 %v2704_v23, %v2704_v23  ;;  %v1670_v43 = vsel %vm1407_vm4, %v1575_v8, 0.0  ;;  %v1473_v46 = vsel %vm1407_vm4, %v2704_v23, 0.0 }
 0x182   : > { %v1665_v56 = vadd.f32 %v1664_v55, %v1663_v50  ;;  %1404 = vst.msk [vmem:[%s2698_s24 + $0xf4] sm:$0xf] %vm1342_vm3, %v2172_v53  ;;  %v1577_v48 = vmul.f32 %v2720_v36, %v2720_v36  ;;  %v1475_v53 = vsel %vm1407_vm4, %v2720_v36, 0.0  ;;  %v1578_v55 = vmul.f32 %v2725_v45, %v2725_v45 }
 0x183   : > { %v1477_v23 = vsel %vm1407_vm4, %v2725_v45, 0.0  ;;  %v1479_v36 = vsel %vm1407_vm4, %v2740_v58, 0.0  ;;  %v1481_v45 = vsel %vm1407_vm4, %v2745_v3, 0.0 }
 0x184   : > { %v951_v60 = vpop.f32.mrb[60].mxu0  ;;  %v3000_v61 = vpop.f32.mrb[60].mxu1 }
 0x185   : > { %v2141_v62 = vpack.c.bf16 %v951_v60, %v951_v60  ;;  %v1467_v2 = vsel %vm1407_vm4, %v951_v60, 0.0  ;;  %v1573_v4 = vmul.f32 %v951_v60, %v951_v60  ;;  %v953_v5 = vpop.f32.mrb[61].mxu0  ;;  %v2173_v6 = vpack.c.bf16 %v3000_v61, %v3000_v61  ;;  %v1081_v7 = vpop.f32.mrb[61].mxu1 }
 0x186   : > { %v1468_v9 = vadd.f32 %v1467_v2, %v1466_v52  ;;  %v954_v10 = vpop.f32.mrb[62].mxu0  ;;  %v3007_v14 = vpop.f32.mrb[62].mxu1  ;;  %v1672_v52 = vsel %vm1407_vm4, %v1576_v35, 0.0  ;;  %v1579_v2 = vmul.f32 %v2740_v58, %v2740_v58  ;;  %v1580_v7 = vmul.f32 %v2745_v3, %v2745_v3 }
 0x187   : > { %1373 = vst.msk [vmem:[%s2698_s24 + $0x78] sm:$0xf] %vm1342_vm3, %v2141_v62  ;;  %v1666_v15 = vsel %vm1407_vm4, %v1573_v4, 0.0  ;;  %v2142_v19 = vpack.c.bf16 %v954_v10, %v954_v10  ;;  %v1469_v20 = vsel %vm1407_vm4, %v954_v10, 0.0  ;;  %v1574_v22 = vmul.f32 %v954_v10, %v954_v10  ;;  %v956_v24 = vpop.f32.mrb[63].mxu0  ;;  %v1084_v26 = vpop.f32.mrb[63].mxu1 }
 0x188   : > { %1405 = vst.msk [vmem:[%s2698_s24 + $0xf8] sm:$0xf] %vm1342_vm3, %v2173_v6  ;;  %v1667_v31 = vadd.f32 %v1666_v15, %v1665_v56  ;;  %v1470_v32 = vadd.f32 %v1469_v20, %v1468_v9  ;;  %v2174_v33 = vpack.c.bf16 %v3007_v14, %v3007_v14  ;;  %v1674_v62 = vsel %vm1407_vm4, %v1577_v48, 0.0 }
 0x189   : > { %1374 = vst.msk [vmem:[%s2698_s24 + $0x7c] sm:$0xf] %vm1342_vm3, %v2142_v19  ;;  %v1668_v39 = vsel %vm1407_vm4, %v1574_v22, 0.0  ;;  %v1676_v6 = vsel %vm1407_vm4, %v1578_v55, 0.0  ;;  %v1678_v10 = vsel %vm1407_vm4, %v1579_v2, 0.0  ;;  %v1581_v15 = vmul.f32 %v2760_v17, %v2760_v17 }
 0x18a   : > { %v1472_v40 = vadd.f32 %v1471_v34, %v1470_v32  ;;  %v1669_v42 = vadd.f32 %v1668_v39, %v1667_v31  ;;  %1406 = vst.msk [vmem:[%s2698_s24 + $0xfc] sm:$0xf] %vm1342_vm3, %v2174_v33  ;;  %v1680_v22 = vsel %vm1407_vm4, %v1580_v7, 0.0  ;;  %v1483_v58 = vsel %vm1407_vm4, %v2760_v17, 0.0  ;;  %s2369_s24 = scalar_lea.vmem %s2368_s22, 32 }
 0x18b   : > { %v1582_v24 = vmul.f32 %v2765_v27, %v2765_v27  ;;  %v1682_v32 = vsel %vm1407_vm4, %v1581_v15, 0.0  ;;  %v1485_v3 = vsel %vm1407_vm4, %v2765_v27, 0.0  ;;  %v1583_v33 = vmul.f32 %v2780_v41, %v2780_v41  ;;  %p2371_p2 = scmp.lt.s32.totalorder %s2369_s24, %s2363_s13 }
 0x18c   : > { %v1474_v16 = vadd.f32 %v1473_v46, %v1472_v40  ;;  %v1671_v50 = vadd.f32 %v1670_v43, %v1669_v42  ;;  %v1487_v17 = vsel %vm1407_vm4, %v2780_v41, 0.0  ;;  %v1584_v40 = vmul.f32 %v2785_v51, %v2785_v51 }
 0x18d   : > { %v1684_v39 = vsel %vm1407_vm4, %v1582_v24, 0.0  ;;  %v1686_v46 = vsel %vm1407_vm4, %v1583_v33, 0.0  ;;  %v1489_v27 = vsel %vm1407_vm4, %v2785_v51, 0.0  ;;  %v1585_v48 = vmul.f32 %v2800_v1, %v2800_v1  ;;  %p2372_p3 = por %p2371_p2, %p2370_p1 }
 0x18e   : > { %v1476_v56 = vadd.f32 %v1475_v53, %v1474_v16  ;;  %v1673_v60 = vadd.f32 %v1672_v52, %v1671_v50  ;;  %v1688_v52 = vsel %vm1407_vm4, %v1584_v40, 0.0  ;;  %v1491_v41 = vsel %vm1407_vm4, %v2800_v1, 0.0 }
 0x18f   : > { %v1586_v53 = vmul.f32 %v2805_v11, %v2805_v11  ;;  %v1493_v51 = vsel %vm1407_vm4, %v2805_v11, 0.0  ;;  %v1495_v1 = vsel %vm1407_vm4, %v2820_v28, 0.0  ;;  %v1497_v11 = vsel %vm1407_vm4, %v2825_v38, 0.0  ;;  %p2373_p5 = pnand %p2372_p3, %p2366_p0 }
 0x190   : > { %v1478_v4 = vadd.f32 %v1477_v23, %v1476_v56  ;;  %v1675_v5 = vadd.f32 %v1674_v62, %v1673_v60  ;;  %v1690_v60 = vsel %vm1407_vm4, %v1585_v48, 0.0  ;;  %v1587_v62 = vmul.f32 %v2820_v28, %v2820_v28 }
 0x191   : > { %v1499_v28 = vsel %vm1407_vm4, %v2840_v54, 0.0  ;;  %v1590_v15 = vmul.f32 %v2845_v0, %v2845_v0  ;;  %v1595_v48 = vmul.f32 %v2900_v12, %v2900_v12 }
 0x192   : > { %v1480_v8 = vadd.f32 %v1479_v36, %v1478_v4  ;;  %v1677_v9 = vadd.f32 %v1676_v6, %v1675_v5  ;;  %v1692_v4 = vsel %vm1407_vm4, %v1586_v53, 0.0  ;;  %v1588_v5 = vmul.f32 %v2825_v38, %v2825_v38 }
 0x193   : > { %v1694_v7 = vsel %vm1407_vm4, %v1587_v62, 0.0  ;;  %v1501_v38 = vsel %vm1407_vm4, %v2845_v0, 0.0  ;;  %v1505_v0 = vsel %vm1407_vm4, %v2865_v30, 0.0 }
 0x194   : > { %v1482_v19 = vadd.f32 %v1481_v45, %v1480_v8  ;;  %v1679_v20 = vadd.f32 %v1678_v10, %v1677_v9  ;;  %v1589_v8 = vmul.f32 %v2840_v54, %v2840_v54  ;;  %v1696_v45 = vsel %vm1407_vm4, %v1588_v5, 0.0 }
 0x195   : > { %v1503_v54 = vsel %vm1407_vm4, %v2860_v18, 0.0 }
 0x196   : > { %v1484_v26 = vadd.f32 %v1483_v58, %v1482_v19  ;;  %v1681_v31 = vadd.f32 %v1680_v22, %v1679_v20  ;;  %v1698_v22 = vsel %vm1407_vm4, %v1589_v8, 0.0  ;;  %v1591_v58 = vmul.f32 %v2860_v18, %v2860_v18 }
 0x197   : > { %v1507_v18 = vsel %vm1407_vm4, %v2880_v47, 0.0  ;;  %v1600_v8 = vmul.f32 %v2945_v29, %v2945_v29 }
 0x198   : > { %v1486_v34 = vadd.f32 %v1485_v3, %v1484_v26  ;;  %v1683_v35 = vadd.f32 %v1682_v32, %v1681_v31  ;;  %v1700_v31 = vsel %vm1407_vm4, %v1590_v15, 0.0  ;;  %v1592_v32 = vmul.f32 %v2865_v30, %v2865_v30 }
 0x199   : > { %v1509_v30 = vsel %vm1407_vm4, %v2885_v59, 0.0 }
 0x19a   : > { %v1685_v42 = vadd.f32 %v1684_v39, %v1683_v35  ;;  %v1488_v43 = vadd.f32 %v1487_v17, %v1486_v34  ;;  %v1702_v34 = vsel %vm1407_vm4, %v1591_v58, 0.0  ;;  %v1593_v35 = vmul.f32 %v2880_v47, %v2880_v47 }
 0x19b   : > { %v1704_v40 = vsel %vm1407_vm4, %v1592_v32, 0.0  ;;  %v1511_v47 = vsel %vm1407_vm4, %v2900_v12, 0.0  ;;  %v1515_v12 = vsel %vm1407_vm4, %v2920_v44, 0.0 }
 0x19c   : > { %v1490_v16 = vadd.f32 %v1489_v27, %v1488_v43  ;;  %v1687_v50 = vadd.f32 %v1686_v46, %v1685_v42  ;;  %v1594_v42 = vmul.f32 %v2885_v59, %v2885_v59  ;;  %v1706_v27 = vsel %vm1407_vm4, %v1593_v35, 0.0 }
 0x19d   : > { %v1513_v59 = vsel %vm1407_vm4, %v2905_v25, 0.0  ;;  %v1529_v35 = vsel %vm1407_vm4, %v2985_v37, 0.0 }
 0x19e   : > { %v1492_v55 = vadd.f32 %v1491_v41, %v1490_v16  ;;  %v1689_v56 = vadd.f32 %v1688_v52, %v1687_v50  ;;  %v1708_v52 = vsel %vm1407_vm4, %v1594_v42, 0.0  ;;  %v1596_v41 = vmul.f32 %v2905_v25, %v2905_v25 }
 0x19f   : > { %v1517_v25 = vsel %vm1407_vm4, %v2925_v57, 0.0  ;;  %v1606_v42 = vmul.f32 %v3007_v14, %v3007_v14 }
 0x1a0   : > { %v1494_v23 = vadd.f32 %v1493_v51, %v1492_v55  ;;  %v1691_v2 = vadd.f32 %v1690_v60, %v1689_v56  ;;  %v1710_v56 = vsel %vm1407_vm4, %v1595_v48, 0.0  ;;  %v1597_v60 = vmul.f32 %v2920_v44, %v2920_v44 }
 0x1a1   : > { %v1519_v44 = vsel %vm1407_vm4, %v2940_v13, 0.0  ;;  %v1732_v48 = vsel %vm1407_vm4, %v1606_v42, 0.0 }
 0x1a2   : > { %v1496_v6 = vadd.f32 %v1495_v1, %v1494_v23  ;;  %v1693_v36 = vadd.f32 %v1692_v4, %v1691_v2  ;;  %v1712_v23 = vsel %vm1407_vm4, %v1596_v41, 0.0  ;;  %v1598_v2 = vmul.f32 %v2925_v57, %v2925_v57 }
 0x1a3   : > { %v1714_v5 = vsel %vm1407_vm4, %v1597_v60, 0.0  ;;  %v1521_v57 = vsel %vm1407_vm4, %v2945_v29, 0.0  ;;  %v1525_v29 = vsel %vm1407_vm4, %v2965_v63, 0.0 }
 0x1a4   : > { %v1498_v9 = vadd.f32 %v1497_v11, %v1496_v6  ;;  %v1695_v10 = vadd.f32 %v1694_v7, %v1693_v36  ;;  %v1599_v6 = vmul.f32 %v2940_v13, %v2940_v13  ;;  %v1716_v11 = vsel %vm1407_vm4, %v1598_v2, 0.0 }
 0x1a5   : > { %v1523_v13 = vsel %vm1407_vm4, %v2960_v49, 0.0 }
 0x1a6   : > { %v1500_v19 = vadd.f32 %v1499_v28, %v1498_v9  ;;  %v1697_v20 = vadd.f32 %v1696_v45, %v1695_v10  ;;  %v1718_v45 = vsel %vm1407_vm4, %v1599_v6, 0.0  ;;  %v1601_v28 = vmul.f32 %v2960_v49, %v2960_v49 }
 0x1a7   : > { %v1527_v49 = vsel %vm1407_vm4, %v2980_v21, 0.0 }
 0x1a8   : > { %v1502_v24 = vadd.f32 %v1501_v38, %v1500_v19  ;;  %v1699_v26 = vadd.f32 %v1698_v22, %v1697_v20  ;;  %v1720_v20 = vsel %vm1407_vm4, %v1600_v8, 0.0  ;;  %v1602_v22 = vmul.f32 %v2965_v63, %v2965_v63 }
 0x1aa   : > { %v1504_v3 = vadd.f32 %v1503_v54, %v1502_v24  ;;  %v1701_v33 = vadd.f32 %v1700_v31, %v1699_v26  ;;  %v1722_v24 = vsel %vm1407_vm4, %v1601_v28, 0.0  ;;  %v1603_v26 = vmul.f32 %v2980_v21, %v2980_v21 }
 0x1ab   : > { %v1724_v32 = vsel %vm1407_vm4, %v1602_v22, 0.0 }
 0x1ac   : > { %v1703_v39 = vadd.f32 %v1702_v34, %v1701_v33  ;;  %v1506_v17 = vadd.f32 %v1505_v0, %v1504_v3  ;;  %v1604_v3 = vmul.f32 %v2985_v37, %v2985_v37  ;;  %v1605_v33 = vmul.f32 %v3000_v61, %v3000_v61 }
 0x1ad   : > { %v1726_v63 = vsel %vm1407_vm4, %v1603_v26, 0.0 }
 0x1ae   : > { %v1705_v43 = vadd.f32 %v1704_v40, %v1703_v39  ;;  %v1508_v46 = vadd.f32 %v1507_v18, %v1506_v17  ;;  %v1531_v39 = vsel %vm1407_vm4, %v3000_v61, 0.0  ;;  %v1728_v21 = vsel %vm1407_vm4, %v1604_v3, 0.0 }
 0x1af   : > { %v1730_v18 = vsel %vm1407_vm4, %v1605_v33, 0.0 }
 0x1b0   : > { %v1707_v16 = vadd.f32 %v1706_v27, %v1705_v43  ;;  %v1510_v50 = vadd.f32 %v1509_v30, %v1508_v46  ;;  %v1533_v27 = vsel %vm1407_vm4, %v3007_v14, 0.0 }
 0x1b2   : > { %v1709_v53 = vadd.f32 %v1708_v52, %v1707_v16  ;;  %v1512_v55 = vadd.f32 %v1511_v47, %v1510_v50 }
 0x1b4   : > { %v1711_v51 = vadd.f32 %v1710_v56, %v1709_v53  ;;  %v1514_v62 = vadd.f32 %v1513_v59, %v1512_v55 }
 0x1b6   : > { %v1713_v4 = vadd.f32 %v1712_v23, %v1711_v51  ;;  %v1516_v1 = vadd.f32 %v1515_v12, %v1514_v62 }
 0x1b8   : > { %v1715_v36 = vadd.f32 %v1714_v5, %v1713_v4  ;;  %v1518_v7 = vadd.f32 %v1517_v25, %v1516_v1 }
 0x1ba   : > { %v1717_v9 = vadd.f32 %v1716_v11, %v1715_v36  ;;  %v1520_v10 = vadd.f32 %v1519_v44, %v1518_v7 }
 0x1bc   : > { %v1719_v15 = vadd.f32 %v1718_v45, %v1717_v9  ;;  %v1522_v19 = vadd.f32 %v1521_v57, %v1520_v10 }
 0x1be   : > { %v1721_v38 = vadd.f32 %v1720_v20, %v1719_v15  ;;  %v1524_v58 = vadd.f32 %v1523_v13, %v1522_v19 }
 0x1c0   : > { %v1723_v31 = vadd.f32 %v1722_v24, %v1721_v38  ;;  %v1526_v54 = vadd.f32 %v1525_v29, %v1524_v58 }
 0x1c2   : > { %v1725_v34 = vadd.f32 %v1724_v32, %v1723_v31  ;;  %v1528_v0 = vadd.f32 %v1527_v49, %v1526_v54 }
 0x1c4   : > { %v1727_v17 = vadd.f32 %v1726_v63, %v1725_v34  ;;  %v1530_v40 = vadd.f32 %v1529_v35, %v1528_v0 }
 0x1c6   : > { %v1729_v43 = vadd.f32 %v1728_v21, %v1727_v17  ;;  %v1532_v46 = vadd.f32 %v1531_v39, %v1530_v40 }
 0x1c8   : > { %v1731_v30 = vadd.f32 %v1730_v18, %v1729_v43  ;;  %v1534_v37 = vadd.f32 %v1533_v27, %v1532_v46 }
 0x1ca   : > { %v1535_v61 = vrot.slane %v1534_v37, 4  ;;  %v1733_v16 = vadd.f32 %v1732_v48, %v1731_v30 }
 0x1cc   : > { %v1536_v50 = vadd.f32 %v1535_v61, %v1534_v37  ;;  %v1734_v52 = vrot.slane %v1733_v16, 4 }
 0x1ce   : > { %v1537_v47 = vrot.slane %v1536_v50, 2  ;;  %v1735_v41 = vadd.f32 %v1734_v52, %v1733_v16 }
 0x1d0   : > { %v1538_v53 = vadd.f32 %v1537_v47, %v1536_v50  ;;  %v1736_v55 = vrot.slane %v1735_v41, 2 }
 0x1d2   : > { %v1539_v14 = vrot.slane %v1538_v53, 1  ;;  %v1737_v56 = vadd.f32 %v1736_v55, %v1735_v41 }
 0x1d4   : > { %v1540_v59 = vadd.f32 %v1539_v14, %v1538_v53  ;;  %v1738_v60 = vrot.slane %v1737_v56, 1 }
 0x1d6   : > { %1542 = vst.msk [vmem:[%s237_s26] sm:$0x1] %vm1541_vm5, %v1540_v59  ;;  %v1739_v51 = vadd.f32 %v1738_v60, %v1737_v56 }
 0x1d7   : > { %2376 = shalt.err (!%p2373_p5)
}
 0x1d8   : > { %s2377_s21 = scalar_lea.hbm %s3191_s8, 16  ;;  %s2381_s7 = scalar_lea.hbm %s3275_s3, 784 }
 0x1d9   : > { %p2378_p6 = scmp.ne.s32.totalorder %s3191_s8, %s2377_s21  ;;  %p2382_p10 = scmp.lt.u32.totalorder %s3191_s8, %s3275_s3 }
 0x1da   : > { %p2383_p11 = scmp.lt.u32.totalorder %s2381_s7, %s2377_s21  ;;  %p2385_p13 = scmp.lt.u32.totalorder %s2377_s21, %s3191_s8 }
 0x1db   : > { %p2379_p7 = pnand %p2378_p6, %p2544_p4 }
 0x1dc   : > { %p2384_p12 = por %p2383_p11, %p2382_p10 }
 0x1dd   : > { %p2380_p9 = pneg %p2379_p7 }
 0x1de   : > { %p2386_p0 = por %p2385_p13, %p2384_p12 }
 0x1e0   : > { %p2387_p1 = pnand %p2386_p0, %p2380_p9 }
 0x1e2   : > { %2390 = shalt.err (!%p2387_p1)
}
 0x1e3   : > { %2195 = dma.vmem_to_hbm [thread:$0]  (%p2544_p4), %s3193_s29, 16, %s3191_s8, %s1750_s12   ;;  %1740 = vst.msk [vmem:[%s243_s30] sm:$0x1] %vm1541_vm5, %v1739_v51 }
 0x1e4   : > { %s1754_s13 = scalar_lea.sflag [#allocation5], %s3181_s9  ;;  %s2391_s14 = scalar_lea.vmem %s3201_s5, 16 }
 0x1e5   : > { %p2392_p2 = scmp.ne.s32.totalorder %s3201_s5, %s2391_s14  ;;  %s2478_s22 = smov [#allocation4]  }
 0x1e6   : > { %s2395_s24 = sshll.u32 %s2478_s22, 4  ;;  %s2396_s24 = int_to_ptr.vmem [resolvable:$false] %s2395_s24 }
 0x1e7   : > { %p2393_p3 = pnand %p2392_p2, %p2544_p4  ;;  %s2397_s21 = scalar_lea.vmem %s2396_s24, 32 }
 0x1e8   : > { %p2398_p6 = scmp.lt.s32.totalorder %s3201_s5, %s2396_s24  ;;  %p2399_p7 = scmp.lt.s32.totalorder %s2397_s21, %s2391_s14 }
 0x1e9   : > { %p2394_p5 = pneg %p2393_p3 }
 0x1ea   : > { %p2400_p9 = por %p2399_p7, %p2398_p6 }
 0x1ec   : > { %p2401_p10 = pnand %p2400_p9, %p2394_p5 }
 0x1ee   : > { %2404 = shalt.err (!%p2401_p10)
}
 0x1ef   : > { %s2405_s9 = scalar_lea.hbm %s3199_s11, 16  ;;  %s2409_s8 = scalar_lea.hbm %s3276_s4, 784 }
 0x1f0   : > { %p2406_p11 = scmp.ne.s32.totalorder %s3199_s11, %s2405_s9  ;;  %p2410_p0 = scmp.lt.u32.totalorder %s3199_s11, %s3276_s4 }
 0x1f1   : > { %p2411_p1 = scmp.lt.u32.totalorder %s2409_s8, %s2405_s9  ;;  %p2413_p3 = scmp.lt.u32.totalorder %s2405_s9, %s3199_s11 }
 0x1f2   : > { %p2407_p12 = pnand %p2406_p11, %p2544_p4 }
 0x1f3   : > { %p2412_p2 = por %p2411_p1, %p2410_p0 }
 0x1f4   : > { %p2408_p13 = pneg %p2407_p12 }
 0x1f5   : > { %p2414_p5 = por %p2413_p3, %p2412_p2 }
 0x1f7   : > { %p2415_p6 = pnand %p2414_p5, %p2408_p13 }
 0x1f9   : > { %2418 = shalt.err (!%p2415_p6)
}
 0x1fa   : > { %2196 = dma.vmem_to_hbm [thread:$0]  (%p2544_p4), %s3201_s5, 16, %s3199_s11, %s1754_s13  }
 0x1fb PF: > { %p2206_p7 = scmp.ge.s32.totalorder %s2473_s20, 2  ;;  %s1808_s6 = sand.u32 1, %s2453_s15  }
 0x1fc   : > { %s1809_s7 = scalar_lea.sflag [#allocation3], %s1808_s6 }
 0x1fd   : > { %p2200_p9 = pnand %p2206_p7, %p2551_p8 }
 0x1ff   : > { %2444 = dma.done.wait (!%p2200_p9), %s1809_s7, 16  }
 0x200   : > { %2446 = vsyncadd (!%p2200_p9), %s1809_s7, 4294967280  ;;  %s1817_s18 = scalar_lea.sflag [#allocation5], %s1808_s6 }
 0x201   : > { %2448 = dma.done.wait (!%p2200_p9), %s1817_s18, 16  }
 0x202   : > { %2450 = vsyncadd (!%p2200_p9), %s1817_s18, 4294967280  ;;  %s21_s20 = sadd.s32 1, %s2473_s20   ;;  %s3279_s15 = smov %s2457_s16 }
 0x203   : > { %p18_p10 = scmp.ge.s32.totalorder %s21_s20, 51   ;;  %s3280_s16 = smov %s2461_s17 }
 0x204   : > { %s3281_s17 = smov %s2557_s28  ;;  %s3282_s18 = smov %s2469_s19 }
 0x205   : > { %s3283_s19 = smov %s3285_s23  ;;  %20 = sbr.rel (!%p18_p10) target bundleno = 6 (0x6), region = 95 }
 0x20c   :  { %1821 = vsyncpa [#allocation3], 1 }
 0x20d   :  { %1823 = vsyncpa [#allocation3 + $0x1], 1 }
 0x20e   :  { %1824 = vsyncpa [#allocation5], 1 }
 0x20f   :  { %1826 = vsyncpa [#allocation5 + $0x1], 1 }

</bundles_post_ra>
